<compile_context>
chip_gen: v6e
topology: v6e:2x2x1
jax: 0.10.0
libtpu: 0.0.40
codegen_flags: <defaults>
</compile_context>

<pallas_src>
import jax
import jax.numpy as jnp
from jax.experimental import pallas as pl
from jax.experimental.pallas import tpu as pltpu

IN_FEATURES = 784
K_PAD = 896          # 7 * 128, lane-aligned padded feature dim
HID = 512
OUT = 10


def mlp_kernel(x_ref, w1_ref, b1_ref, w2_ref, b2_ref, w3_ref, b3_ref, o_ref):
    # x_ref: (TILE_B, K_PAD) bf16; weights (in, out) bf16; biases (1, out) f32.
    x = x_ref[...]

    h1 = jnp.dot(x, w1_ref[...], preferred_element_type=jnp.float32) + b1_ref[...]
    h1 = jnp.maximum(h1, 0.0).astype(jnp.bfloat16)          # ReLU in f32, cast for MXU

    h2 = jnp.dot(h1, w2_ref[...], preferred_element_type=jnp.float32) + b2_ref[...]
    h2 = jnp.maximum(h2, 0.0).astype(jnp.bfloat16)

    logits = jnp.dot(h2, w3_ref[...], preferred_element_type=jnp.float32) + b3_ref[...]

    # Numerically stable log_softmax along the class axis (all f32).
    m = jnp.max(logits, axis=-1, keepdims=True)
    shifted = logits - m
    lse = jnp.log(jnp.sum(jnp.exp(shifted), axis=-1, keepdims=True))
    o_ref[...] = shifted - lse


def mnist_mlp_forward(x, params, tile_b=512):
    """x: any shape whose trailing elements flatten to multiples of 784
    (e.g. (B,1,28,28) NCHW, like PyTorch's x.view(-1, 784))."""
    w1, b1, w2, b2, w3, b3 = params

    xf = x.reshape(-1, IN_FEATURES).astype(jnp.float32)
    B = xf.shape[0]

    # Zero-pad features 784 -> 896 (zeros don't change the matmul result).
    xf = jnp.pad(xf, ((0, 0), (0, K_PAD - IN_FEATURES)))
    w1p = jnp.pad(w1.astype(jnp.float32), ((0, K_PAD - IN_FEATURES), (0, 0)))

    # Batch tile: large for throughput, small (multiple of 8) for tiny batches.
    TILE_B = min(tile_b, max(8, ((B + 7) // 8) * 8))
    B_pad = ((B + TILE_B - 1) // TILE_B) * TILE_B
    if B_pad != B:
        xf = jnp.pad(xf, ((0, B_pad - B), (0, 0)))

    # bf16 MXU inputs; f32 accumulation inside the kernel.
    xb = xf.astype(jnp.bfloat16)
    w1b = w1p.astype(jnp.bfloat16)
    w2b = w2.astype(jnp.bfloat16)
    w3b = w3.astype(jnp.bfloat16)
    b1f = b1.astype(jnp.float32)
    b2f = b2.astype(jnp.float32)
    b3f = b3.astype(jnp.float32)

    grid = (B_pad // TILE_B,)

    flops = 2 * B_pad * (K_PAD * HID + HID * HID + HID * OUT)
    bytes_accessed = (
        B_pad * K_PAD * 2                       # x (bf16)
        + (K_PAD * HID + HID * HID + HID * OUT) * 2   # weights (bf16)
        + (2 * HID + OUT) * 4                   # biases (f32)
        + B_pad * OUT * 4                       # output (f32)
    )

    out = pl.pallas_call(
        mlp_kernel,
        out_shape=jax.ShapeDtypeStruct((B_pad, OUT), jnp.float32),
        grid=grid,
        in_specs=[
            pl.BlockSpec((TILE_B, K_PAD), lambda i: (i, 0)),   # x: tiled over batch
            pl.BlockSpec((K_PAD, HID), lambda i: (0, 0)),      # w1: resident
            pl.BlockSpec((1, HID), lambda i: (0, 0)),          # b1
            pl.BlockSpec((HID, HID), lambda i: (0, 0)),        # w2
            pl.BlockSpec((1, HID), lambda i: (0, 0)),          # b2
            pl.BlockSpec((HID, OUT), lambda i: (0, 0)),        # w3
            pl.BlockSpec((1, OUT), lambda i: (0, 0)),          # b3
        ],
        out_specs=pl.BlockSpec((TILE_B, OUT), lambda i: (i, 0)),
        compiler_params=pltpu.CompilerParams(
            dimension_semantics=("parallel",),
            vmem_limit_bytes=32 << 20,
        ),
        cost_estimate=pl.CostEstimate(
            flops=flops,
            transcendentals=B_pad * (OUT + 1),
            bytes_accessed=bytes_accessed,
        ),
    )(xb, w1b, b1f, w2b, b2f, w3b, b3f)

    return out[:B]


def init_params(key):
    """Deterministic init mimicking nn.Linear default (U[-1/sqrt(fan_in), +])."""
    def linear(key, fan_in, fan_out):
        kw, kb = jax.random.split(key)
        bound = 1.0 / jnp.sqrt(fan_in)
        w = jax.random.uniform(kw, (fan_in, fan_out), jnp.float32, -bound, bound)
        b = jax.random.uniform(kb, (1, fan_out), jnp.float32, -bound, bound)
        return w, b

    k1, k2, k3 = jax.random.split(key, 3)
    w1, b1 = linear(k1, IN_FEATURES, HID)
    w2, b2 = linear(k2, HID, HID)
    w3, b3 = linear(k3, HID, OUT)
    return (w1, b1, w2, b2, w3, b3)


def ref_forward_bf16(x, params):
    """Pure-JAX reference mirroring the kernel's bf16-input / f32-accum numerics."""
    w1, b1, w2, b2, w3, b3 = params
    xb = x.reshape(-1, IN_FEATURES).astype(jnp.bfloat16)
    h1 = jnp.maximum(
        jnp.dot(xb, w1.astype(jnp.bfloat16), preferred_element_type=jnp.float32) + b1, 0.0
    ).astype(jnp.bfloat16)
    h2 = jnp.maximum(
        jnp.dot(h1, w2.astype(jnp.bfloat16), preferred_element_type=jnp.float32) + b2, 0.0
    ).astype(jnp.bfloat16)
    logits = jnp.dot(h2, w3.astype(jnp.bfloat16), preferred_element_type=jnp.float32) + b3
    return jax.nn.log_softmax(logits, axis=1)


if __name__ == "__main__":
    key = jax.random.PRNGKey(0)
    kx, kp = jax.random.split(key)

    # Small MNIST-like batch: (B=2, C=1, H=28, W=28), NCHW.
    x = jax.random.normal(kx, (2, 1, 28, 28), jnp.float32)
    params = init_params(kp)

    out = mnist_mlp_forward(x, params)
    out = jax.block_until_ready(out)

    ref = ref_forward_bf16(x, params)
    assert out.shape == (2, 10)
    assert jnp.allclose(out, ref, atol=2e-3, rtol=2e-3), (
        f"max abs diff {jnp.max(jnp.abs(out - ref))}"
    )

    print("KERNEL_OK")
</pallas_src>

<mosaic_0001>
module attributes {stable_mosaic.version = 11 : i64} {
  func.func @mlp_kernel(%arg0: i32, %arg1: memref<8x896xbf16, #tpu.memory_space<vmem>>, %arg2: memref<896x512xbf16, #tpu.memory_space<vmem>>, %arg3: memref<1x512xf32, #tpu.memory_space<vmem>>, %arg4: memref<512x512xbf16, #tpu.memory_space<vmem>>, %arg5: memref<1x512xf32, #tpu.memory_space<vmem>>, %arg6: memref<512x10xbf16, #tpu.memory_space<vmem>>, %arg7: memref<1x10xf32, #tpu.memory_space<vmem>>, %arg8: memref<8x10xf32, #tpu.memory_space<vmem>>) attributes {dimension_semantics = [#tpu.dimension_semantics<parallel>], iteration_bounds = array<i64: 1>, scalar_prefetch = 0 : i64, scratch_operands = 0 : i64, tpu.core_type = #tpu.core_type<tc>, window_params = [{transform_indices = @transform_0, window_bounds = array<i64: 8, 896>}, {pipeline_mode = #tpu.pipeline_mode<synchronous>, transform_indices = @transform_1, window_bounds = array<i64: 896, 512>}, {pipeline_mode = #tpu.pipeline_mode<synchronous>, transform_indices = @transform_2, window_bounds = array<i64: 1, 512>}, {pipeline_mode = #tpu.pipeline_mode<synchronous>, transform_indices = @transform_3, window_bounds = array<i64: 512, 512>}, {pipeline_mode = #tpu.pipeline_mode<synchronous>, transform_indices = @transform_4, window_bounds = array<i64: 1, 512>}, {pipeline_mode = #tpu.pipeline_mode<synchronous>, transform_indices = @transform_5, window_bounds = array<i64: 512, 10>}, {pipeline_mode = #tpu.pipeline_mode<synchronous>, transform_indices = @transform_6, window_bounds = array<i64: 1, 10>}, {transform_indices = @transform_7, window_bounds = array<i64: 8, 10>}]} {
    %c0 = arith.constant 0 : index
    %c0_0 = arith.constant 0 : index
    %0 = vector.load %arg1[%c0, %c0_0] : memref<8x896xbf16, #tpu.memory_space<vmem>>, vector<8x896xbf16>
    %c0_1 = arith.constant 0 : index
    %c0_2 = arith.constant 0 : index
    %1 = vector.load %arg2[%c0_1, %c0_2] : memref<896x512xbf16, #tpu.memory_space<vmem>>, vector<896x512xbf16>
    %cst = arith.constant dense<0.000000e+00> : vector<8x512xf32>
    %2 = tpu.matmul %0, %1, %cst {dimension_numbers = #tpu.dot_dimension_numbers<[1], [0], [0], [1], [0, 0, 1, 1], [], []>} : vector<8x896xbf16>, vector<896x512xbf16>, vector<8x512xf32> -> vector<8x512xf32>
    %c0_3 = arith.constant 0 : index
    %c0_4 = arith.constant 0 : index
    %3 = vector.load %arg3[%c0_3, %c0_4] : memref<1x512xf32, #tpu.memory_space<vmem>>, vector<1x512xf32>
    %4 = vector.broadcast %3 : vector<1x512xf32> to vector<8x512xf32>
    %5 = arith.addf %2, %4 : vector<8x512xf32>
    %cst_5 = arith.constant 0.000000e+00 : f32
    %6 = vector.broadcast %cst_5 : f32 to vector<8x512xf32>
    %7 = arith.maximumf %5, %6 : vector<8x512xf32>
    %8 = arith.truncf %7 : vector<8x512xf32> to vector<8x512xbf16>
    %c0_6 = arith.constant 0 : index
    %c0_7 = arith.constant 0 : index
    %9 = vector.load %arg4[%c0_6, %c0_7] : memref<512x512xbf16, #tpu.memory_space<vmem>>, vector<512x512xbf16>
    %cst_8 = arith.constant dense<0.000000e+00> : vector<8x512xf32>
    %10 = tpu.matmul %8, %9, %cst_8 {dimension_numbers = #tpu.dot_dimension_numbers<[1], [0], [0], [1], [0, 0, 1, 1], [], []>} : vector<8x512xbf16>, vector<512x512xbf16>, vector<8x512xf32> -> vector<8x512xf32>
    %c0_9 = arith.constant 0 : index
    %c0_10 = arith.constant 0 : index
    %11 = vector.load %arg5[%c0_9, %c0_10] : memref<1x512xf32, #tpu.memory_space<vmem>>, vector<1x512xf32>
    %12 = vector.broadcast %11 : vector<1x512xf32> to vector<8x512xf32>
    %13 = arith.addf %10, %12 : vector<8x512xf32>
    %cst_11 = arith.constant 0.000000e+00 : f32
    %14 = vector.broadcast %cst_11 : f32 to vector<8x512xf32>
    %15 = arith.maximumf %13, %14 : vector<8x512xf32>
    %16 = arith.truncf %15 : vector<8x512xf32> to vector<8x512xbf16>
    %c0_12 = arith.constant 0 : index
    %c0_13 = arith.constant 0 : index
    %17 = vector.load %arg6[%c0_12, %c0_13] : memref<512x10xbf16, #tpu.memory_space<vmem>>, vector<512x10xbf16>
    %cst_14 = arith.constant dense<0.000000e+00> : vector<8x10xf32>
    %18 = tpu.matmul %16, %17, %cst_14 {dimension_numbers = #tpu.dot_dimension_numbers<[1], [0], [0], [1], [0, 0, 1, 1], [], []>} : vector<8x512xbf16>, vector<512x10xbf16>, vector<8x10xf32> -> vector<8x10xf32>
    %c0_15 = arith.constant 0 : index
    %c0_16 = arith.constant 0 : index
    %19 = vector.load %arg7[%c0_15, %c0_16] : memref<1x10xf32, #tpu.memory_space<vmem>>, vector<1x10xf32>
    %20 = vector.broadcast %19 : vector<1x10xf32> to vector<8x10xf32>
    %21 = arith.addf %18, %20 : vector<8x10xf32>
    %cst_17 = arith.constant dense<0xFF800000> : vector<8xf32>
    %22 = vector.multi_reduction <maximumf>, %21, %cst_17 [1] : vector<8x10xf32> to vector<8xf32>
    %23 = vector.shape_cast %22 : vector<8xf32> to vector<8x1xf32>
    %24 = vector.broadcast %23 : vector<8x1xf32> to vector<8x10xf32>
    %25 = arith.subf %21, %24 : vector<8x10xf32>
    %26 = math.exp %25 : vector<8x10xf32>
    %cst_18 = arith.constant dense<0.000000e+00> : vector<8xf32>
    %27 = vector.multi_reduction <add>, %26, %cst_18 [1] : vector<8x10xf32> to vector<8xf32>
    %28 = vector.shape_cast %27 : vector<8xf32> to vector<8x1xf32>
    %29 = math.log %28 : vector<8x1xf32>
    %30 = vector.broadcast %29 : vector<8x1xf32> to vector<8x10xf32>
    %31 = arith.subf %25, %30 : vector<8x10xf32>
    %c0_19 = arith.constant 0 : index
    %c0_20 = arith.constant 0 : index
    %32 = vector.load %arg8[%c0_19, %c0_20] : memref<8x10xf32, #tpu.memory_space<vmem>>, vector<8x10xf32>
    tpu.vector_store %arg8[%c0_19, %c0_20], %31 {strides = array<i32>} : memref<8x10xf32, #tpu.memory_space<vmem>>, vector<8x10xf32>,
    return
  }
  func.func @transform_0(%arg0: i32) -> (i32, i32) {
    %c0_i32 = arith.constant 0 : i32
    %c0_i32_0 = arith.constant 0 : i32
    return %arg0, %c0_i32 : i32, i32
  }
  func.func @transform_1(%arg0: i32) -> (i32, i32) {
    %c0_i32 = arith.constant 0 : i32
    %c0_i32_0 = arith.constant 0 : i32
    %c0_i32_1 = arith.constant 0 : i32
    return %c0_i32, %c0_i32_0 : i32, i32
  }
  func.func @transform_2(%arg0: i32) -> (i32, i32) {
    %c0_i32 = arith.constant 0 : i32
    %c0_i32_0 = arith.constant 0 : i32
    %c0_i32_1 = arith.constant 0 : i32
    return %c0_i32, %c0_i32_0 : i32, i32
  }
  func.func @transform_3(%arg0: i32) -> (i32, i32) {
    %c0_i32 = arith.constant 0 : i32
    %c0_i32_0 = arith.constant 0 : i32
    %c0_i32_1 = arith.constant 0 : i32
    return %c0_i32, %c0_i32_0 : i32, i32
  }
  func.func @transform_4(%arg0: i32) -> (i32, i32) {
    %c0_i32 = arith.constant 0 : i32
    %c0_i32_0 = arith.constant 0 : i32
    %c0_i32_1 = arith.constant 0 : i32
    return %c0_i32, %c0_i32_0 : i32, i32
  }
  func.func @transform_5(%arg0: i32) -> (i32, i32) {
    %c0_i32 = arith.constant 0 : i32
    %c0_i32_0 = arith.constant 0 : i32
    %c0_i32_1 = arith.constant 0 : i32
    return %c0_i32, %c0_i32_0 : i32, i32
  }
  func.func @transform_6(%arg0: i32) -> (i32, i32) {
    %c0_i32 = arith.constant 0 : i32
    %c0_i32_0 = arith.constant 0 : i32
    %c0_i32_1 = arith.constant 0 : i32
    return %c0_i32, %c0_i32_0 : i32, i32
  }
  func.func @transform_7(%arg0: i32) -> (i32, i32) {
    %c0_i32 = arith.constant 0 : i32
    %c0_i32_0 = arith.constant 0 : i32
    return %arg0, %c0_i32 : i32, i32
  }
}

</mosaic_0001>

<bundles_post_ra>
// kernel: tpu_custom_call.1
= control target key start
LH: loop header
LB: loop body
LE: loop exit
PB: predicated region body
PF: predicated region fallthrough
CT: control target
= control target key end

     0   :  { %12 = vsyncpa [#allocation3], 0  ;;  %s4460_s0 = inlined_call_operand.vmem [shape: bf16[8,896], index: 0, kind: input, shape index: {}]   ;;  %s4461_s1 = inlined_call_operand.hbm [shape: bf16[896,512], index: 1, kind: input, shape index: {}]   ;;  %s4462_s2 = inlined_call_operand.vmem [shape: f32[1,512], index: 2, kind: input, shape index: {}]   ;;  %s4463_s3 = inlined_call_operand.hbm [shape: bf16[512,512], index: 3, kind: input, shape index: {}]   ;;  %s4464_s4 = inlined_call_operand.vmem [shape: f32[1,512], index: 4, kind: input, shape index: {}]   ;;  %s4465_s5 = inlined_call_operand.vmem [shape: bf16[512,10], index: 5, kind: input, shape index: {}]   ;;  %s4466_s6 = inlined_call_operand.vmem [shape: f32[1,10], index: 6, kind: input, shape index: {}]   ;;  %s4467_s7 = inlined_call_operand.hbm [shape: f32[8,10], index: 7, kind: output, shape index: {}]  }
   0x1   :  { %13 = vsyncpa [#allocation6], 0 }
   0x2   :  { %14 = vsyncpa [#allocation4], 0  ;;  %s4202_s24 = smov [#allocation2]  }
   0x3   :  { %s22_s25 = sshll.u32 %s4202_s24, 4  ;;  %s23_s25 = int_to_ptr.vmem [resolvable:$true] %s22_s25 }
   0x4   :  { %s4144_s26 = scalar_lea.vmem %s23_s25, 28672  ;;  %p4149_p1 = scmp.lt.s32.totalorder %s23_s25, %s23_s25 }
   0x5   :  { %p4145_p0 = scmp.ne.s32.totalorder %s23_s25, %s4144_s26  ;;  %p4150_p2 = scmp.lt.s32.totalorder %s4144_s26, %s4144_s26 }
   0x7   :  { %p4151_p3 = por %p4150_p2, %p4149_p1 }
   0x9   :  { %p4152_p4 = pnand %p4151_p3, %p4145_p0 }
   0xb   :  { %4155 = shalt.err (!%p4152_p4)
}
   0xc   :  { %s4203_s27 = smov 256   ;;  %s4204_s28 = smov 16  }
   0xd   :  { %28 = dma.hbm_to_vmem [thread:$0]  %s4461_s1, 28672, %s23_s25, [#allocation3], %s4203_s27, %s4203_s27, %s4204_s28  }
   0xe   :  { %s4205_s8 = smov [#allocation5]  }
   0xf   :  { %s36_s9 = sshll.u32 %s4205_s8, 4  ;;  %s37_s9 = int_to_ptr.vmem [resolvable:$true] %s36_s9 }
  0x10   :  { %s4164_s10 = scalar_lea.vmem %s37_s9, 16384  ;;  %p4169_p6 = scmp.lt.s32.totalorder %s37_s9, %s37_s9 }
  0x11   :  { %p4165_p5 = scmp.ne.s32.totalorder %s37_s9, %s4164_s10  ;;  %p4170_p7 = scmp.lt.s32.totalorder %s4164_s10, %s4164_s10 }
  0x13   :  { %p4171_p8 = por %p4170_p7, %p4169_p6 }
  0x15   :  { %p4172_p9 = pnand %p4171_p8, %p4165_p5 }
  0x17   :  { %4175 = shalt.err (!%p4172_p9)
}
  0x18   :  { %42 = dma.hbm_to_vmem [thread:$0]  %s4463_s3, 16384, %s37_s9, [#allocation6], %s4203_s27, %s4203_s27, %s4204_s28  }
  0x19   :  { %4196 = dma.done.wait [#allocation3], 28672  }
  0x1a   :  { %4197 = vsyncadd [#allocation3], 4294938624 }
  0x1b   :  { %4198 = dma.done.wait [#allocation6], 16384  }
  0x1c   :  { %4199 = vsyncadd [#allocation6], 4294950912  ;;  %v3564_v0 = vld [vmem:[#allocation2 + $0xe4] ss:$16 sps:$4 sm:$0xff]   ;;  %v3568_v2 = vld [vmem:[#allocation2 + $0xe0] ss:$16 sps:$4 sm:$0xff]  }
  0x1d   :  { %v3566_v1 = vld [vmem:[#allocation2 + $0x2e4] ss:$16 sps:$4 sm:$0xff]   ;;  %1451 = vmatprep.subr.bf16.mxu0 %v3564_v0  ;;  %v3569_v3 = vld [vmem:[#allocation2 + $0x2e0] ss:$16 sps:$4 sm:$0xff]   ;;  %v57_v48 = vld [vmem:[%s4460_s0 + $0x8] sm:$0xff]  ;;  %vm3092_vm0 = vcmask 80896  }
  0x1e   :  { %1492 = vmatprep.subr.bf16.mxu1 %v3566_v1  ;;  %v3570_v4 = vld [vmem:[#allocation2 + $0xc4] ss:$16 sps:$4 sm:$0xff]   ;;  %1452 = vmatpush1.bf16.msra.mxu0 %v3568_v2  ;;  %v3574_v6 = vld [vmem:[#allocation2 + $0xc0] ss:$16 sps:$4 sm:$0xff]   ;;  %v4262_v51 = vcombine.high %v57_v48, %v57_v48 }
  0x1f   :  { %1493 = vmatpush1.bf16.msra.mxu1 %v3569_v3  ;;  %v3572_v5 = vld [vmem:[#allocation2 + $0x2c4] ss:$16 sps:$4 sm:$0xff]   ;;  %1453 = vmatprep.subr.bf16.mxu0 %v3570_v4  ;;  %v3575_v7 = vld [vmem:[#allocation2 + $0x2c0] ss:$16 sps:$4 sm:$0xff]  }
  0x20   :  { %1494 = vmatprep.subr.bf16.mxu1 %v3572_v5  ;;  %v3576_v8 = vld [vmem:[#allocation2 + $0xa4] ss:$16 sps:$4 sm:$0xff]   ;;  %v3580_v10 = vld [vmem:[#allocation2 + $0xa0] ss:$16 sps:$4 sm:$0xff]   ;;  %1524 = vmatprep.mubr.bf16.mxu1 %v4262_v51 }
  0x21   :  { %v3578_v9 = vld [vmem:[#allocation2 + $0x2a4] ss:$16 sps:$4 sm:$0xff]   ;;  %v3581_v11 = vld [vmem:[#allocation2 + $0x2a0] ss:$16 sps:$4 sm:$0xff]  }
  0x22   :  { %1454 = vmatpush1.bf16.msra.mxu0 %v3574_v6  ;;  %v3582_v12 = vld [vmem:[#allocation2 + $0x84] ss:$16 sps:$4 sm:$0xff]   ;;  %v3586_v14 = vld [vmem:[#allocation2 + $0x80] ss:$16 sps:$4 sm:$0xff]  }
  0x23   :  { %1495 = vmatpush1.bf16.msra.mxu1 %v3575_v7  ;;  %1455 = vmatprep.subr.bf16.mxu0 %v3576_v8  ;;  %v3584_v13 = vld [vmem:[#allocation2 + $0x284] ss:$16 sps:$4 sm:$0xff]   ;;  %v3587_v15 = vld [vmem:[#allocation2 + $0x280] ss:$16 sps:$4 sm:$0xff]   ;;  %v4268_v7 = vcombine.low %v57_v48, %v57_v48  ;;  %v3724_v48 = vld [vmem:[#allocation2 + $0xcc] ss:$16 sps:$4 sm:$0xff]  }
  0x24   :  { %1496 = vmatprep.subr.bf16.mxu1 %v3578_v9  ;;  %v3588_v16 = vld [vmem:[#allocation2 + $0x64] ss:$16 sps:$4 sm:$0xff]   ;;  %v3592_v18 = vld [vmem:[#allocation2 + $0x60] ss:$16 sps:$4 sm:$0xff]  }
  0x25   :  { %v3590_v17 = vld [vmem:[#allocation2 + $0x264] ss:$16 sps:$4 sm:$0xff]   ;;  %v3593_v19 = vld [vmem:[#allocation2 + $0x260] ss:$16 sps:$4 sm:$0xff]  }
  0x26   :  { %1456 = vmatpush1.bf16.msra.mxu0 %v3580_v10  ;;  %v3594_v20 = vld [vmem:[#allocation2 + $0x44] ss:$16 sps:$4 sm:$0xff]   ;;  %v3598_v22 = vld [vmem:[#allocation2 + $0x40] ss:$16 sps:$4 sm:$0xff]  }
  0x27   :  { %1497 = vmatpush1.bf16.msra.mxu1 %v3581_v11  ;;  %1457 = vmatprep.subr.bf16.mxu0 %v3582_v12  ;;  %v3596_v21 = vld [vmem:[#allocation2 + $0x244] ss:$16 sps:$4 sm:$0xff]   ;;  %v3599_v23 = vld [vmem:[#allocation2 + $0x240] ss:$16 sps:$4 sm:$0xff]  }
  0x28   :  { %1498 = vmatprep.subr.bf16.mxu1 %v3584_v13  ;;  %v3600_v24 = vld [vmem:[#allocation2 + $0x24] ss:$16 sps:$4 sm:$0xff]   ;;  %v3604_v26 = vld [vmem:[#allocation2 + $0x20] ss:$16 sps:$4 sm:$0xff]  }
  0x29   :  { %v3602_v25 = vld [vmem:[#allocation2 + $0x224] ss:$16 sps:$4 sm:$0xff]   ;;  %v3605_v27 = vld [vmem:[#allocation2 + $0x220] ss:$16 sps:$4 sm:$0xff]  }
  0x2a   :  { %1458 = vmatpush1.bf16.msra.mxu0 %v3586_v14  ;;  %v3606_v28 = vld [vmem:[#allocation2 + $0x4] ss:$16 sps:$4 sm:$0xff]   ;;  %v3610_v30 = vld [vmem:[#allocation2] ss:$16 sps:$4 sm:$0xff]  }
  0x2b   :  { %1499 = vmatpush1.bf16.msra.mxu1 %v3587_v15  ;;  %1459 = vmatprep.subr.bf16.mxu0 %v3588_v16  ;;  %v3608_v29 = vld [vmem:[#allocation2 + $0x204] ss:$16 sps:$4 sm:$0xff]   ;;  %v3611_v31 = vld [vmem:[#allocation2 + $0x200] ss:$16 sps:$4 sm:$0xff]   ;;  %v4206_v16 = vmov 0  }
  0x2c   :  { %1500 = vmatprep.subr.bf16.mxu1 %v3590_v17  ;;  %v3612_v32 = vld [vmem:[#allocation2 + $0x1e4] ss:$16 sps:$4 sm:$0xff]   ;;  %v3616_v34 = vld [vmem:[#allocation2 + $0x1e0] ss:$16 sps:$4 sm:$0xff]  }
  0x2d   :  { %v3614_v33 = vld [vmem:[#allocation2 + $0x3e4] ss:$16 sps:$4 sm:$0xff]   ;;  %v3617_v35 = vld [vmem:[#allocation2 + $0x3e0] ss:$16 sps:$4 sm:$0xff]  }
  0x2e   :  { %1460 = vmatpush1.bf16.msra.mxu0 %v3592_v18  ;;  %v3618_v36 = vld [vmem:[#allocation2 + $0x1c4] ss:$16 sps:$4 sm:$0xff]   ;;  %v3622_v38 = vld [vmem:[#allocation2 + $0x1c0] ss:$16 sps:$4 sm:$0xff]  }
  0x2f   :  { %1501 = vmatpush1.bf16.msra.mxu1 %v3593_v19  ;;  %1461 = vmatprep.subr.bf16.mxu0 %v3594_v20  ;;  %v3620_v37 = vld [vmem:[#allocation2 + $0x3c4] ss:$16 sps:$4 sm:$0xff]   ;;  %v3623_v39 = vld [vmem:[#allocation2 + $0x3c0] ss:$16 sps:$4 sm:$0xff]  }
  0x30   :  { %1502 = vmatprep.subr.bf16.mxu1 %v3596_v21  ;;  %v3624_v40 = vld [vmem:[#allocation2 + $0x1a4] ss:$16 sps:$4 sm:$0xff]   ;;  %v3628_v42 = vld [vmem:[#allocation2 + $0x1a0] ss:$16 sps:$4 sm:$0xff]  }
  0x31   :  { %v3626_v41 = vld [vmem:[#allocation2 + $0x3a4] ss:$16 sps:$4 sm:$0xff]   ;;  %v3629_v43 = vld [vmem:[#allocation2 + $0x3a0] ss:$16 sps:$4 sm:$0xff]  }
  0x32   :  { %1462 = vmatpush1.bf16.msra.mxu0 %v3598_v22  ;;  %v3630_v44 = vld [vmem:[#allocation2 + $0x184] ss:$16 sps:$4 sm:$0xff]   ;;  %v3634_v49 = vld [vmem:[#allocation2 + $0x180] ss:$16 sps:$4 sm:$0xff]  }
  0x33   :  { %1503 = vmatpush1.bf16.msra.mxu1 %v3599_v23  ;;  %1463 = vmatprep.subr.bf16.mxu0 %v3600_v24  ;;  %v3632_v45 = vld [vmem:[#allocation2 + $0x384] ss:$16 sps:$4 sm:$0xff]   ;;  %v3635_v50 = vld [vmem:[#allocation2 + $0x380] ss:$16 sps:$4 sm:$0xff]  }
  0x34   :  { %1504 = vmatprep.subr.bf16.mxu1 %v3602_v25  ;;  %v56_v46 = vld [vmem:[%s4460_s0] sm:$0xff] }
  0x35   :  { %v4257_v47 = vcombine.high %v56_v46, %v56_v46  ;;  %v3636_v52 = vld [vmem:[#allocation2 + $0x164] ss:$16 sps:$4 sm:$0xff]   ;;  %v3640_v54 = vld [vmem:[#allocation2 + $0x160] ss:$16 sps:$4 sm:$0xff]   ;;  %v4266_v6 = vcombine.low %v56_v46, %v56_v46 }
  0x36   :  { %1464 = vmatpush1.bf16.msra.mxu0 %v3604_v26  ;;  %v3638_v53 = vld [vmem:[#allocation2 + $0x364] ss:$16 sps:$4 sm:$0xff]   ;;  %v3641_v55 = vld [vmem:[#allocation2 + $0x360] ss:$16 sps:$4 sm:$0xff]  }
  0x37   :  { %1505 = vmatpush1.bf16.msra.mxu1 %v3605_v27  ;;  %1465 = vmatprep.subr.bf16.mxu0 %v3606_v28  ;;  %v3642_v56 = vld [vmem:[#allocation2 + $0x144] ss:$16 sps:$4 sm:$0xff]   ;;  %v3646_v58 = vld [vmem:[#allocation2 + $0x140] ss:$16 sps:$4 sm:$0xff]  }
  0x38   :  { %1506 = vmatprep.subr.bf16.mxu1 %v3608_v29  ;;  %1483 = vmatprep.mubr.bf16.mxu0 %v4257_v47  ;;  %v3644_v57 = vld [vmem:[#allocation2 + $0x344] ss:$16 sps:$4 sm:$0xff]   ;;  %v3647_v59 = vld [vmem:[#allocation2 + $0x340] ss:$16 sps:$4 sm:$0xff]  }
  0x39   :  { %v3648_v60 = vld [vmem:[#allocation2 + $0x124] ss:$16 sps:$4 sm:$0xff]   ;;  %v3652_v62 = vld [vmem:[#allocation2 + $0x120] ss:$16 sps:$4 sm:$0xff]  }
  0x3a   :  { %1466 = vmatpush1.bf16.msra.mxu0 %v3610_v30  ;;  %v3650_v61 = vld [vmem:[#allocation2 + $0x324] ss:$16 sps:$4 sm:$0xff]   ;;  %v3653_v63 = vld [vmem:[#allocation2 + $0x320] ss:$16 sps:$4 sm:$0xff]  }
  0x3b   :  { %1507 = vmatpush1.bf16.msra.mxu1 %v3611_v31  ;;  %1467 = vmatprep.subr.bf16.mxu0 %v3612_v32  ;;  %v3654_v0 = vld [vmem:[#allocation2 + $0x104] ss:$16 sps:$4 sm:$0xff]   ;;  %v3658_v2 = vld [vmem:[#allocation2 + $0x100] ss:$16 sps:$4 sm:$0xff]  }
  0x3c   :  { %1508 = vmatprep.subr.bf16.mxu1 %v3614_v33  ;;  %v3656_v1 = vld [vmem:[#allocation2 + $0x304] ss:$16 sps:$4 sm:$0xff]   ;;  %v3659_v3 = vld [vmem:[#allocation2 + $0x300] ss:$16 sps:$4 sm:$0xff]  }
  0x3d   :  { %v3666_v4 = vld [vmem:[#allocation2 + $0x4e4] ss:$16 sps:$4 sm:$0xff]   ;;  %v3664_v8 = vld [vmem:[#allocation2 + $0x4e0] ss:$16 sps:$4 sm:$0xff]  }
  0x3e   :  { %1468 = vmatpush2.bf16.msra.mxu0 %v3616_v34  ;;  %v3669_v5 = vld [vmem:[#allocation2 + $0x6e4] ss:$16 sps:$4 sm:$0xff]   ;;  %v3667_v9 = vld [vmem:[#allocation2 + $0x6e0] ss:$16 sps:$4 sm:$0xff]  }
  0x3f   :  { %1509 = vmatpush2.bf16.msra.mxu1 %v3617_v35  ;;  %1469 = vmatprep.subr.bf16.mxu0 %v3618_v36  ;;  %v3672_v10 = vld [vmem:[#allocation2 + $0x4c4] ss:$16 sps:$4 sm:$0xff]   ;;  %v3670_v12 = vld [vmem:[#allocation2 + $0x4c0] ss:$16 sps:$4 sm:$0xff]  }
  0x40   :  { %1510 = vmatprep.subr.bf16.mxu1 %v3620_v37  ;;  %v3675_v11 = vld [vmem:[#allocation2 + $0x6c4] ss:$16 sps:$4 sm:$0xff]   ;;  %v3673_v13 = vld [vmem:[#allocation2 + $0x6c0] ss:$16 sps:$4 sm:$0xff]  }
  0x41   :  { %v3678_v14 = vld [vmem:[#allocation2 + $0x4a4] ss:$16 sps:$4 sm:$0xff]   ;;  %v3676_v17 = vld [vmem:[#allocation2 + $0x4a0] ss:$16 sps:$4 sm:$0xff]  }
  0x42   :  { %1470 = vmatpush2.bf16.msra.mxu0 %v3622_v38  ;;  %v3681_v15 = vld [vmem:[#allocation2 + $0x6a4] ss:$16 sps:$4 sm:$0xff]   ;;  %v3679_v18 = vld [vmem:[#allocation2 + $0x6a0] ss:$16 sps:$4 sm:$0xff]  }
  0x43   :  { %1511 = vmatpush2.bf16.msra.mxu1 %v3623_v39  ;;  %1471 = vmatprep.subr.bf16.mxu0 %v3624_v40  ;;  %v3684_v19 = vld [vmem:[#allocation2 + $0x484] ss:$16 sps:$4 sm:$0xff]   ;;  %v3682_v21 = vld [vmem:[#allocation2 + $0x480] ss:$16 sps:$4 sm:$0xff]  }
  0x44   :  { %1512 = vmatprep.subr.bf16.mxu1 %v3626_v41  ;;  %v3687_v20 = vld [vmem:[#allocation2 + $0x684] ss:$16 sps:$4 sm:$0xff]   ;;  %v3685_v22 = vld [vmem:[#allocation2 + $0x680] ss:$16 sps:$4 sm:$0xff]  }
  0x45   :  { %v3690_v23 = vld [vmem:[#allocation2 + $0x464] ss:$16 sps:$4 sm:$0xff]   ;;  %v3688_v25 = vld [vmem:[#allocation2 + $0x460] ss:$16 sps:$4 sm:$0xff]  }
  0x46   :  { %1472 = vmatpush2.bf16.msra.mxu0 %v3628_v42  ;;  %v3693_v24 = vld [vmem:[#allocation2 + $0x664] ss:$16 sps:$4 sm:$0xff]   ;;  %v3691_v26 = vld [vmem:[#allocation2 + $0x660] ss:$16 sps:$4 sm:$0xff]   ;;  %v3718_v42 = vld [vmem:[#allocation2 + $0xec] ss:$16 sps:$4 sm:$0xff]  }
  0x47   :  { %1513 = vmatpush2.bf16.msra.mxu1 %v3629_v43  ;;  %1473 = vmatprep.subr.bf16.mxu0 %v3630_v44  ;;  %v3696_v27 = vld [vmem:[#allocation2 + $0x444] ss:$16 sps:$4 sm:$0xff]   ;;  %v3694_v29 = vld [vmem:[#allocation2 + $0x440] ss:$16 sps:$4 sm:$0xff]   ;;  %v3715_v44 = vld [vmem:[%s4460_s0 + $0x18] ss:$0 sps:$4 sm:$0xff]  }
  0x48   :  { %1514 = vmatprep.subr.bf16.mxu1 %v3632_v45  ;;  %v3699_v28 = vld [vmem:[#allocation2 + $0x644] ss:$16 sps:$4 sm:$0xff]   ;;  %v3697_v30 = vld [vmem:[#allocation2 + $0x640] ss:$16 sps:$4 sm:$0xff]   ;;  %v3716_v45 = vld [vmem:[#allocation2 + $0xe8] ss:$16 sps:$4 sm:$0xff]  }
  0x49   :  { %v3702_v31 = vld [vmem:[#allocation2 + $0x424] ss:$16 sps:$4 sm:$0xff]   ;;  %v3700_v34 = vld [vmem:[#allocation2 + $0x420] ss:$16 sps:$4 sm:$0xff]  }
  0x4a   :  { %1474 = vmatpush2.bf16.msra.mxu0 %v3634_v49  ;;  %v3705_v32 = vld [vmem:[#allocation2 + $0x624] ss:$16 sps:$4 sm:$0xff]   ;;  %v3703_v36 = vld [vmem:[#allocation2 + $0x620] ss:$16 sps:$4 sm:$0xff]  }
  0x4b   :  { %1515 = vmatpush2.bf16.msra.mxu1 %v3635_v50  ;;  %1475 = vmatprep.subr.bf16.mxu0 %v3636_v52  ;;  %v4276_v33 = vld [vmem:[%s4460_s0 + $0x10] sm:$0xff]  ;;  %v3722_v50 = vld [vmem:[#allocation2 + $0xc8] ss:$16 sps:$4 sm:$0xff]  }
  0x4c   :  { %1516 = vmatprep.subr.bf16.mxu1 %v3638_v53  ;;  %v4280_v35 = vcombine.high %v4276_v33, %v4276_v33  ;;  %v3708_v37 = vld [vmem:[#allocation2 + $0x404] ss:$16 sps:$4 sm:$0xff]   ;;  %v3706_v39 = vld [vmem:[#allocation2 + $0x400] ss:$16 sps:$4 sm:$0xff]   ;;  %v3730_v53 = vld [vmem:[#allocation2 + $0xac] ss:$16 sps:$4 sm:$0xff]  }
  0x4d   :  { %v3711_v38 = vld [vmem:[#allocation2 + $0x604] ss:$16 sps:$4 sm:$0xff]   ;;  %v3709_v40 = vld [vmem:[#allocation2 + $0x600] ss:$16 sps:$4 sm:$0xff]  }
  0x4e   :  { %1476 = vmatpush2.bf16.msra.mxu0 %v3640_v54  ;;  %v3714_v41 = vld [vmem:[#allocation2 + $0x5e4] ss:$16 sps:$4 sm:$0xff]   ;;  %v3712_v43 = vld [vmem:[#allocation2 + $0x5e0] ss:$16 sps:$4 sm:$0xff]  }
  0x4f   :  { %1517 = vmatpush2.bf16.msra.mxu1 %v3641_v55  ;;  %1477 = vmatprep.subr.bf16.mxu0 %v3642_v56  ;;  %v3721_v46 = vld [vmem:[#allocation2 + $0x5c4] ss:$16 sps:$4 sm:$0xff]   ;;  %v3719_v49 = vld [vmem:[#allocation2 + $0x5c0] ss:$16 sps:$4 sm:$0xff]   ;;  %v3728_v55 = vld [vmem:[#allocation2 + $0xa8] ss:$16 sps:$4 sm:$0xff]  }
  0x50   :  { %1518 = vmatprep.subr.bf16.mxu1 %v3644_v57  ;;  %v3727_v52 = vld [vmem:[#allocation2 + $0x5a4] ss:$16 sps:$4 sm:$0xff]   ;;  %v3725_v54 = vld [vmem:[#allocation2 + $0x5a0] ss:$16 sps:$4 sm:$0xff]   ;;  %v3736_v57 = vld [vmem:[#allocation2 + $0x8c] ss:$16 sps:$4 sm:$0xff]  }
  0x51   :  { %v3733_v56 = vld [vmem:[#allocation2 + $0x584] ss:$16 sps:$4 sm:$0xff]  }
  0x52   :  { %1478 = vmatpush2.bf16.msra.mxu0 %v3646_v58  ;;  %v3731_v58 = vld [vmem:[#allocation2 + $0x580] ss:$16 sps:$4 sm:$0xff]  }
  0x53   :  { %1519 = vmatpush2.bf16.msra.mxu1 %v3647_v59  ;;  %1479 = vmatprep.subr.bf16.mxu0 %v3648_v60  ;;  %v3734_v59 = vld [vmem:[#allocation2 + $0x88] ss:$16 sps:$4 sm:$0xff]   ;;  %v3739_v60 = vld [vmem:[#allocation2 + $0x564] ss:$16 sps:$4 sm:$0xff]  }
  0x54   :  { %1520 = vmatprep.subr.bf16.mxu1 %v3650_v61  ;;  %v3742_v61 = vld [vmem:[#allocation2 + $0x6c] ss:$16 sps:$4 sm:$0xff]  }
  0x56   :  { %1480 = vmatpush2.bf16.msra.mxu0 %v3652_v62  ;;  %v3737_v62 = vld [vmem:[#allocation2 + $0x560] ss:$16 sps:$4 sm:$0xff]  }
  0x57   :  { %1521 = vmatpush2.bf16.msra.mxu1 %v3653_v63  ;;  %1481 = vmatprep.subr.bf16.mxu0 %v3654_v0  ;;  %v3745_v63 = vld [vmem:[#allocation2 + $0x544] ss:$16 sps:$4 sm:$0xff]   ;;  %v3748_v0 = vld [vmem:[#allocation2 + $0x4c] ss:$16 sps:$4 sm:$0xff]  }
  0x58   :  { %1522 = vmatprep.subr.bf16.mxu1 %v3656_v1  ;;  %v3743_v1 = vld [vmem:[#allocation2 + $0x540] ss:$16 sps:$4 sm:$0xff]  }
  0x5a   :  { %1482 = vmatpush2.bf16.msra.mxu0 %v3658_v2  ;;  %v3746_v2 = vld [vmem:[#allocation2 + $0x48] ss:$16 sps:$4 sm:$0xff]  }
  0x5b   :  { %1523 = vmatpush2.bf16.msra.mxu1 %v3659_v3  ;;  %1533 = vmatprep.subr.bf16.mxu0 %v3666_v4  ;;  %v3751_v3 = vld [vmem:[#allocation2 + $0x524] ss:$16 sps:$4 sm:$0xff]   ;;  %v3754_v4 = vld [vmem:[#allocation2 + $0x2c] ss:$16 sps:$4 sm:$0xff]  }
  0x5c   :  { %1574 = vmatprep.subr.bf16.mxu1 %v3669_v5  ;;  %v3749_v5 = vld [vmem:[#allocation2 + $0x520] ss:$16 sps:$4 sm:$0xff]  }
  0x5d   :  { %1484 = vmatmul.mubr.bf16.vlgmr.msra.gmra.mxu0 %v4266_v6 }
  0x5e   :  { %1525 = vmatmul.mubr.bf16.vlgmr.msra.gmra.mxu1 %v4268_v7  ;;  %1534 = vmatpush1.bf16.msra.mxu0 %v3664_v8  ;;  %v3752_v8 = vld [vmem:[#allocation2 + $0x28] ss:$16 sps:$4 sm:$0xff]  }
  0x5f   :  { %1575 = vmatpush1.bf16.msra.mxu1 %v3667_v9  ;;  %1535 = vmatprep.subr.bf16.mxu0 %v3672_v10  ;;  %v3757_v9 = vld [vmem:[#allocation2 + $0x504] ss:$16 sps:$4 sm:$0xff]   ;;  %v3760_v10 = vld [vmem:[#allocation2 + $0xc] ss:$16 sps:$4 sm:$0xff]  }
  0x60   :  { %1576 = vmatprep.subr.bf16.mxu1 %v3675_v11  ;;  %1606 = vmatprep.mubr.bf16.mxu1 %v4206_v16  ;;  %v3755_v11 = vld [vmem:[#allocation2 + $0x500] ss:$16 sps:$4 sm:$0xff]  }
  0x61   :  { %1565 = vmatprep.mubr.bf16.mxu0 %v4280_v35 }
  0x62   :  { %1536 = vmatpush1.bf16.msra.mxu0 %v3670_v12  ;;  %v3758_v12 = vld [vmem:[#allocation2 + $0x8] ss:$16 sps:$4 sm:$0xff]  }
  0x63   :  { %1577 = vmatpush1.bf16.msra.mxu1 %v3673_v13  ;;  %1537 = vmatprep.subr.bf16.mxu0 %v3678_v14  ;;  %v3765_v13 = vld [vmem:[#allocation2 + $0x1ec] ss:$16 sps:$4 sm:$0xff]  }
  0x64   :  { %1578 = vmatprep.subr.bf16.mxu1 %v3681_v15  ;;  %v3768_v14 = vld [vmem:[#allocation2 + $0x2ec] ss:$16 sps:$4 sm:$0xff]   ;;  %v4289_v15 = vcombine.low %v4276_v33, %v4276_v33  ;;  %v3787_v33 = vld [vmem:[#allocation2 + $0x168] ss:$16 sps:$4 sm:$0xff]  }
  0x66   :  { %1538 = vmatpush1.bf16.msra.mxu0 %v3676_v17  ;;  %v3763_v17 = vld [vmem:[#allocation2 + $0x1e8] ss:$16 sps:$4 sm:$0xff]  }
  0x67   :  { %1579 = vmatpush1.bf16.msra.mxu1 %v3679_v18  ;;  %1539 = vmatprep.subr.bf16.mxu0 %v3684_v19  ;;  %v3766_v18 = vld [vmem:[#allocation2 + $0x2e8] ss:$16 sps:$4 sm:$0xff]   ;;  %v3771_v19 = vld [vmem:[#allocation2 + $0x1cc] ss:$16 sps:$4 sm:$0xff]  }
  0x68   :  { %1580 = vmatprep.subr.bf16.mxu1 %v3687_v20  ;;  %v3774_v20 = vld [vmem:[#allocation2 + $0x2cc] ss:$16 sps:$4 sm:$0xff]  }
  0x6a   :  { %1540 = vmatpush1.bf16.msra.mxu0 %v3682_v21  ;;  %v3769_v21 = vld [vmem:[#allocation2 + $0x1c8] ss:$16 sps:$4 sm:$0xff]  }
  0x6b   :  { %1581 = vmatpush1.bf16.msra.mxu1 %v3685_v22  ;;  %1541 = vmatprep.subr.bf16.mxu0 %v3690_v23  ;;  %v3772_v22 = vld [vmem:[#allocation2 + $0x2c8] ss:$16 sps:$4 sm:$0xff]   ;;  %v3777_v23 = vld [vmem:[#allocation2 + $0x1ac] ss:$16 sps:$4 sm:$0xff]  }
  0x6c   :  { %1582 = vmatprep.subr.bf16.mxu1 %v3693_v24  ;;  %v3780_v24 = vld [vmem:[#allocation2 + $0x2ac] ss:$16 sps:$4 sm:$0xff]  }
  0x6e   :  { %1542 = vmatpush1.bf16.msra.mxu0 %v3688_v25  ;;  %v3775_v25 = vld [vmem:[#allocation2 + $0x1a8] ss:$16 sps:$4 sm:$0xff]  }
  0x6f   :  { %1583 = vmatpush1.bf16.msra.mxu1 %v3691_v26  ;;  %1543 = vmatprep.subr.bf16.mxu0 %v3696_v27  ;;  %v3778_v26 = vld [vmem:[#allocation2 + $0x2a8] ss:$16 sps:$4 sm:$0xff]   ;;  %v3783_v27 = vld [vmem:[#allocation2 + $0x18c] ss:$16 sps:$4 sm:$0xff]  }
  0x70   :  { %1584 = vmatprep.subr.bf16.mxu1 %v3699_v28  ;;  %v3786_v28 = vld [vmem:[#allocation2 + $0x28c] ss:$16 sps:$4 sm:$0xff]  }
  0x72   :  { %1544 = vmatpush1.bf16.msra.mxu0 %v3694_v29  ;;  %v3781_v29 = vld [vmem:[#allocation2 + $0x188] ss:$16 sps:$4 sm:$0xff]  }
  0x73   :  { %1585 = vmatpush1.bf16.msra.mxu1 %v3697_v30  ;;  %1545 = vmatprep.subr.bf16.mxu0 %v3702_v31  ;;  %v3784_v30 = vld [vmem:[#allocation2 + $0x288] ss:$16 sps:$4 sm:$0xff]   ;;  %v3789_v31 = vld [vmem:[#allocation2 + $0x16c] ss:$16 sps:$4 sm:$0xff]  }
  0x74   :  { %1586 = vmatprep.subr.bf16.mxu1 %v3705_v32  ;;  %v3792_v32 = vld [vmem:[#allocation2 + $0x26c] ss:$16 sps:$4 sm:$0xff]  }
  0x76   :  { %1546 = vmatpush1.bf16.msra.mxu0 %v3700_v34  ;;  %v3795_v34 = vld [vmem:[#allocation2 + $0x14c] ss:$16 sps:$4 sm:$0xff]  }
  0x77   :  { %1587 = vmatpush1.bf16.msra.mxu1 %v3703_v36  ;;  %1547 = vmatprep.subr.bf16.mxu0 %v3708_v37  ;;  %v3798_v36 = vld [vmem:[#allocation2 + $0x24c] ss:$16 sps:$4 sm:$0xff]   ;;  %v3793_v37 = vld [vmem:[#allocation2 + $0x148] ss:$16 sps:$4 sm:$0xff]  }
  0x78   :  { %1588 = vmatprep.subr.bf16.mxu1 %v3711_v38  ;;  %v3796_v38 = vld [vmem:[#allocation2 + $0x248] ss:$16 sps:$4 sm:$0xff]  }
  0x7a   :  { %1548 = vmatpush1.bf16.msra.mxu0 %v3706_v39  ;;  %v3801_v39 = vld [vmem:[#allocation2 + $0x12c] ss:$16 sps:$4 sm:$0xff]  }
  0x7b   :  { %1589 = vmatpush1.bf16.msra.mxu1 %v3709_v40  ;;  %1549 = vmatprep.subr.bf16.mxu0 %v3714_v41  ;;  %v3804_v40 = vld [vmem:[#allocation2 + $0x22c] ss:$16 sps:$4 sm:$0xff]   ;;  %v3799_v41 = vld [vmem:[#allocation2 + $0x128] ss:$16 sps:$4 sm:$0xff]  }
  0x7c   :  { %1615 = vmatprep.subr.bf16.mxu1 %v3718_v42  ;;  %v3802_v42 = vld [vmem:[#allocation2 + $0x228] ss:$16 sps:$4 sm:$0xff]  }
  0x7e   :  { %1607 = vmatmul.mubr.bf16.vlgmr.msra.gmra.mxu1 %v3715_v44  ;;  %1550 = vmatpush2.bf16.msra.mxu0 %v3712_v43  ;;  %v3807_v43 = vld [vmem:[#allocation2 + $0x10c] ss:$16 sps:$4 sm:$0xff]  }
  0x7f   :  { %1616 = vmatpush1.bf16.msra.mxu1 %v3716_v45  ;;  %1551 = vmatprep.subr.bf16.mxu0 %v3721_v46  ;;  %v3810_v44 = vld [vmem:[#allocation2 + $0x20c] ss:$16 sps:$4 sm:$0xff]   ;;  %v3805_v45 = vld [vmem:[#allocation2 + $0x108] ss:$16 sps:$4 sm:$0xff]  }
  0x80   :  { %1617 = vmatprep.subr.bf16.mxu1 %v3724_v48  ;;  %1647 = vmatprep.mubr.bf16.mxu1 %v4257_v47  ;;  %v3740_v47 = vld [vmem:[#allocation2 + $0x68] ss:$16 sps:$4 sm:$0xff]   ;;  %v3813_v48 = vld [vmem:[#allocation2 + $0x3ec] ss:$16 sps:$4 sm:$0xff]  }
  0x81   :  { %v3808_v46 = vld [vmem:[#allocation2 + $0x208] ss:$16 sps:$4 sm:$0xff]  }
  0x82   :  { %1552 = vmatpush2.bf16.msra.mxu0 %v3719_v49  ;;  %v3816_v49 = vld [vmem:[#allocation2 + $0x4ec] ss:$16 sps:$4 sm:$0xff]  }
  0x83   :  { %1618 = vmatpush1.bf16.msra.mxu1 %v3722_v50  ;;  %1553 = vmatprep.subr.bf16.mxu0 %v3727_v52  ;;  %v3811_v50 = vld [vmem:[#allocation2 + $0x3e8] ss:$16 sps:$4 sm:$0xff]  }
  0x84   :  { %1619 = vmatprep.subr.bf16.mxu1 %v3730_v53  ;;  %v3814_v52 = vld [vmem:[#allocation2 + $0x4e8] ss:$16 sps:$4 sm:$0xff]   ;;  %v3819_v53 = vld [vmem:[#allocation2 + $0x3cc] ss:$16 sps:$4 sm:$0xff]  }
  0x86   :  { %1554 = vmatpush2.bf16.msra.mxu0 %v3725_v54  ;;  %v3822_v54 = vld [vmem:[#allocation2 + $0x4cc] ss:$16 sps:$4 sm:$0xff]  }
  0x87   :  { %1620 = vmatpush1.bf16.msra.mxu1 %v3728_v55  ;;  %1555 = vmatprep.subr.bf16.mxu0 %v3733_v56  ;;  %v3817_v55 = vld [vmem:[#allocation2 + $0x3c8] ss:$16 sps:$4 sm:$0xff]  }
  0x88   :  { %1621 = vmatprep.subr.bf16.mxu1 %v3736_v57  ;;  %v3820_v56 = vld [vmem:[#allocation2 + $0x4c8] ss:$16 sps:$4 sm:$0xff]   ;;  %v3825_v57 = vld [vmem:[#allocation2 + $0x3ac] ss:$16 sps:$4 sm:$0xff]  }
  0x8a   :  { %1556 = vmatpush2.bf16.msra.mxu0 %v3731_v58  ;;  %v3828_v58 = vld [vmem:[#allocation2 + $0x4ac] ss:$16 sps:$4 sm:$0xff]  }
  0x8b   :  { %1622 = vmatpush1.bf16.msra.mxu1 %v3734_v59  ;;  %1557 = vmatprep.subr.bf16.mxu0 %v3739_v60  ;;  %v3823_v59 = vld [vmem:[#allocation2 + $0x3a8] ss:$16 sps:$4 sm:$0xff]  }
  0x8c   :  { %1623 = vmatprep.subr.bf16.mxu1 %v3742_v61  ;;  %v3826_v60 = vld [vmem:[#allocation2 + $0x4a8] ss:$16 sps:$4 sm:$0xff]   ;;  %v3831_v61 = vld [vmem:[#allocation2 + $0x38c] ss:$16 sps:$4 sm:$0xff]  }
  0x8e   :  { %1558 = vmatpush2.bf16.msra.mxu0 %v3737_v62  ;;  %v3834_v62 = vld [vmem:[#allocation2 + $0x48c] ss:$16 sps:$4 sm:$0xff]  }
  0x8f   :  { %1624 = vmatpush1.bf16.msra.mxu1 %v3740_v47  ;;  %1559 = vmatprep.subr.bf16.mxu0 %v3745_v63  ;;  %v3829_v47 = vld [vmem:[#allocation2 + $0x388] ss:$16 sps:$4 sm:$0xff]   ;;  %v3837_v63 = vld [vmem:[#allocation2 + $0x36c] ss:$16 sps:$4 sm:$0xff]  }
  0x90   :  { %1625 = vmatprep.subr.bf16.mxu1 %v3748_v0  ;;  %v3840_v0 = vld [vmem:[#allocation2 + $0x46c] ss:$16 sps:$4 sm:$0xff]  }
  0x92   :  { %1560 = vmatpush2.bf16.msra.mxu0 %v3743_v1  ;;  %v3835_v1 = vld [vmem:[#allocation2 + $0x368] ss:$16 sps:$4 sm:$0xff]  }
  0x93   :  { %1626 = vmatpush1.bf16.msra.mxu1 %v3746_v2  ;;  %1561 = vmatprep.subr.bf16.mxu0 %v3751_v3  ;;  %v3838_v2 = vld [vmem:[#allocation2 + $0x468] ss:$16 sps:$4 sm:$0xff]   ;;  %v3843_v3 = vld [vmem:[#allocation2 + $0x34c] ss:$16 sps:$4 sm:$0xff]  }
  0x94   :  { %1627 = vmatprep.subr.bf16.mxu1 %v3754_v4  ;;  %v3846_v4 = vld [vmem:[#allocation2 + $0x44c] ss:$16 sps:$4 sm:$0xff]  }
  0x96   :  { %1562 = vmatpush2.bf16.msra.mxu0 %v3749_v5  ;;  %v3844_v5 = vld [vmem:[#allocation2 + $0x448] ss:$16 sps:$4 sm:$0xff]  }
  0x97   :  { %1628 = vmatpush1.bf16.msra.mxu1 %v3752_v8  ;;  %1563 = vmatprep.subr.bf16.mxu0 %v3757_v9  ;;  %v3849_v8 = vld [vmem:[#allocation2 + $0x32c] ss:$16 sps:$4 sm:$0xff]  }
  0x98   :  { %1629 = vmatprep.subr.bf16.mxu1 %v3760_v10  ;;  %v3852_v9 = vld [vmem:[#allocation2 + $0x42c] ss:$16 sps:$4 sm:$0xff]   ;;  %v3847_v10 = vld [vmem:[#allocation2 + $0x328] ss:$16 sps:$4 sm:$0xff]  }
  0x9a   :  { %1564 = vmatpush2.bf16.msra.mxu0 %v3755_v11  ;;  %v3850_v11 = vld [vmem:[#allocation2 + $0x428] ss:$16 sps:$4 sm:$0xff]  }
  0x9b   :  { %1630 = vmatpush1.bf16.msra.mxu1 %v3758_v12  ;;  %1656 = vmatprep.subr.bf16.mxu0 %v3768_v14  ;;  %v3855_v12 = vld [vmem:[#allocation2 + $0x30c] ss:$16 sps:$4 sm:$0xff]   ;;  %v3853_v14 = vld [vmem:[#allocation2 + $0x308] ss:$16 sps:$4 sm:$0xff]  }
  0x9c   :  { %1631 = vmatprep.subr.bf16.mxu1 %v3765_v13  ;;  %v3858_v13 = vld [vmem:[#allocation2 + $0x40c] ss:$16 sps:$4 sm:$0xff]  }
  0x9d   :  { %1566 = vmatmul.mubr.bf16.vlgmr.msra.gmra.mxu0 %v4289_v15 }
  0x9e   :  { %1657 = vmatpush1.bf16.msra.mxu0 %v3766_v18  ;;  %1688 = vmatprep.mubr.bf16.mxu0 %v4262_v51  ;;  %v3790_v51 = vld [vmem:[#allocation2 + $0x268] ss:$16 sps:$4 sm:$0xff]   ;;  %v3861_v18 = vld [vmem:[#allocation2 + $0x5ec] ss:$16 sps:$4 sm:$0xff]  }
  0x9f   :  { %1632 = vmatpush2.bf16.msra.mxu1 %v3763_v17  ;;  %1658 = vmatprep.subr.bf16.mxu0 %v3774_v20  ;;  %v3856_v17 = vld [vmem:[#allocation2 + $0x408] ss:$16 sps:$4 sm:$0xff]  }
  0xa0   :  { %1633 = vmatprep.subr.bf16.mxu1 %v3771_v19  ;;  %v3864_v19 = vld [vmem:[#allocation2 + $0x6ec] ss:$16 sps:$4 sm:$0xff]   ;;  %v3859_v20 = vld [vmem:[#allocation2 + $0x5e8] ss:$16 sps:$4 sm:$0xff]  }
  0xa2   :  { %1659 = vmatpush1.bf16.msra.mxu0 %v3772_v22  ;;  %v3867_v22 = vld [vmem:[#allocation2 + $0x5cc] ss:$16 sps:$4 sm:$0xff]  }
  0xa3   :  { %1634 = vmatpush2.bf16.msra.mxu1 %v3769_v21  ;;  %1660 = vmatprep.subr.bf16.mxu0 %v3780_v24  ;;  %v3862_v21 = vld [vmem:[#allocation2 + $0x6e8] ss:$16 sps:$4 sm:$0xff]  }
  0xa4   :  { %1635 = vmatprep.subr.bf16.mxu1 %v3777_v23  ;;  %v3870_v23 = vld [vmem:[#allocation2 + $0x6cc] ss:$16 sps:$4 sm:$0xff]   ;;  %v3865_v24 = vld [vmem:[#allocation2 + $0x5c8] ss:$16 sps:$4 sm:$0xff]  }
  0xa6   :  { %1661 = vmatpush1.bf16.msra.mxu0 %v3778_v26  ;;  %v3873_v26 = vld [vmem:[#allocation2 + $0x5ac] ss:$16 sps:$4 sm:$0xff]  }
  0xa7   :  { %1636 = vmatpush2.bf16.msra.mxu1 %v3775_v25  ;;  %1662 = vmatprep.subr.bf16.mxu0 %v3786_v28  ;;  %v3868_v25 = vld [vmem:[#allocation2 + $0x6c8] ss:$16 sps:$4 sm:$0xff]  }
  0xa8   :  { %1637 = vmatprep.subr.bf16.mxu1 %v3783_v27  ;;  %v3876_v27 = vld [vmem:[#allocation2 + $0x6ac] ss:$16 sps:$4 sm:$0xff]   ;;  %v3871_v28 = vld [vmem:[#allocation2 + $0x5a8] ss:$16 sps:$4 sm:$0xff]  }
  0xaa   :  { %1663 = vmatpush1.bf16.msra.mxu0 %v3784_v30  ;;  %v3879_v30 = vld [vmem:[#allocation2 + $0x58c] ss:$16 sps:$4 sm:$0xff]  }
  0xab   :  { %1638 = vmatpush2.bf16.msra.mxu1 %v3781_v29  ;;  %1664 = vmatprep.subr.bf16.mxu0 %v3792_v32  ;;  %v3874_v29 = vld [vmem:[#allocation2 + $0x6a8] ss:$16 sps:$4 sm:$0xff]  }
  0xac   :  { %1639 = vmatprep.subr.bf16.mxu1 %v3789_v31  ;;  %v3882_v31 = vld [vmem:[#allocation2 + $0x68c] ss:$16 sps:$4 sm:$0xff]   ;;  %v3877_v32 = vld [vmem:[#allocation2 + $0x588] ss:$16 sps:$4 sm:$0xff]  }
  0xae   :  { %1665 = vmatpush1.bf16.msra.mxu0 %v3790_v51  ;;  %v3888_v51 = vld [vmem:[#allocation2 + $0x66c] ss:$16 sps:$4 sm:$0xff]  }
  0xaf   :  { %1640 = vmatpush2.bf16.msra.mxu1 %v3787_v33  ;;  %1666 = vmatprep.subr.bf16.mxu0 %v3798_v36  ;;  %v3880_v33 = vld [vmem:[#allocation2 + $0x688] ss:$16 sps:$4 sm:$0xff]  }
  0xb0   :  { %1641 = vmatprep.subr.bf16.mxu1 %v3795_v34  ;;  %v3883_v34 = vld [vmem:[#allocation2 + $0x568] ss:$16 sps:$4 sm:$0xff]  }
  0xb1   :  { %v3886_v36 = vld [vmem:[#allocation2 + $0x668] ss:$16 sps:$4 sm:$0xff]  }
  0xb2   :  { %1667 = vmatpush1.bf16.msra.mxu0 %v3796_v38  ;;  %v3889_v38 = vld [vmem:[#allocation2 + $0x548] ss:$16 sps:$4 sm:$0xff]  }
  0xb3   :  { %1642 = vmatpush2.bf16.msra.mxu1 %v3793_v37  ;;  %1668 = vmatprep.subr.bf16.mxu0 %v3804_v40  ;;  %v3891_v37 = vld [vmem:[#allocation2 + $0x54c] ss:$16 sps:$4 sm:$0xff]  }
  0xb4   :  { %1643 = vmatprep.subr.bf16.mxu1 %v3801_v39  ;;  %v3892_v39 = vld [vmem:[#allocation2 + $0x648] ss:$16 sps:$4 sm:$0xff]   ;;  %v3897_v40 = vld [vmem:[#allocation2 + $0x52c] ss:$16 sps:$4 sm:$0xff]  }
  0xb6   :  { %1669 = vmatpush1.bf16.msra.mxu0 %v3802_v42  ;;  %v3895_v42 = vld [vmem:[#allocation2 + $0x528] ss:$16 sps:$4 sm:$0xff]  }
  0xb7   :  { %1644 = vmatpush2.bf16.msra.mxu1 %v3799_v41  ;;  %1670 = vmatprep.subr.bf16.mxu0 %v3810_v44  ;;  %v3900_v41 = vld [vmem:[#allocation2 + $0x62c] ss:$16 sps:$4 sm:$0xff]  }
  0xb8   :  { %1645 = vmatprep.subr.bf16.mxu1 %v3807_v43  ;;  %v3898_v43 = vld [vmem:[#allocation2 + $0x628] ss:$16 sps:$4 sm:$0xff]   ;;  %v3903_v44 = vld [vmem:[#allocation2 + $0x50c] ss:$16 sps:$4 sm:$0xff]  }
  0xba   :  { %1671 = vmatpush1.bf16.msra.mxu0 %v3808_v46  ;;  %v3901_v46 = vld [vmem:[#allocation2 + $0x508] ss:$16 sps:$4 sm:$0xff]  }
  0xbb   :  { %1646 = vmatpush2.bf16.msra.mxu1 %v3805_v45  ;;  %1672 = vmatprep.subr.bf16.mxu0 %v3813_v48  ;;  %v3906_v45 = vld [vmem:[#allocation2 + $0x60c] ss:$16 sps:$4 sm:$0xff]   ;;  %v3904_v48 = vld [vmem:[#allocation2 + $0x608] ss:$16 sps:$4 sm:$0xff]  }
  0xbc   :  { %1697 = vmatprep.subr.bf16.mxu1 %v3816_v49  ;;  %v3909_v49 = vld [vmem:[#allocation5 + $0xe4] ss:$16 sps:$4 sm:$0xff]  }
  0xbe   :  { %1648 = vmatmul.mubr.bf16.vlgmr.msra.gmra.mxu1 %v4266_v6  ;;  %1673 = vmatpush2.bf16.msra.mxu0 %v3811_v50  ;;  %v3832_v6 = vld [vmem:[#allocation2 + $0x488] ss:$16 sps:$4 sm:$0xff]   ;;  %v3907_v50 = vld [vmem:[#allocation5 + $0xe0] ss:$16 sps:$4 sm:$0xff]  }
  0xbf   :  { %1698 = vmatpush1.bf16.msra.mxu1 %v3814_v52  ;;  %1674 = vmatprep.subr.bf16.mxu0 %v3819_v53  ;;  %v3912_v52 = vld [vmem:[#allocation5 + $0xc4] ss:$16 sps:$4 sm:$0xff]   ;;  %v4135_v53 = vld [vmem:[%s4460_s0 + $0x18] ss:$0 sps:$4 sm:$0xff]  }
  0xc0   :  { %1699 = vmatprep.subr.bf16.mxu1 %v3822_v54  ;;  %1729 = vmatprep.mubr.bf16.mxu1 %v4280_v35  ;;  %v3841_v35 = vld [vmem:[#allocation2 + $0x348] ss:$16 sps:$4 sm:$0xff]   ;;  %v3910_v54 = vld [vmem:[#allocation5 + $0xc0] ss:$16 sps:$4 sm:$0xff]  }
  0xc2   :  { %1675 = vmatpush2.bf16.msra.mxu0 %v3817_v55  ;;  %v3915_v55 = vld [vmem:[#allocation5 + $0xa4] ss:$16 sps:$4 sm:$0xff]  }
  0xc3   :  { %1700 = vmatpush1.bf16.msra.mxu1 %v3820_v56  ;;  %1676 = vmatprep.subr.bf16.mxu0 %v3825_v57  ;;  %v3913_v56 = vld [vmem:[#allocation5 + $0xa0] ss:$16 sps:$4 sm:$0xff]   ;;  %v3918_v57 = vld [vmem:[#allocation5 + $0x84] ss:$16 sps:$4 sm:$0xff]  }
  0xc4   :  { %1701 = vmatprep.subr.bf16.mxu1 %v3828_v58  ;;  %v3916_v58 = vld [vmem:[#allocation5 + $0x80] ss:$16 sps:$4 sm:$0xff]  }
  0xc6   :  { %1677 = vmatpush2.bf16.msra.mxu0 %v3823_v59  ;;  %v3979_v59 = vld [vmem:[#allocation5 + $0x2e0] ss:$16 sps:$4 sm:$0xff]  }
  0xc7   :  { %1702 = vmatpush1.bf16.msra.mxu1 %v3826_v60  ;;  %1678 = vmatprep.subr.bf16.mxu0 %v3831_v61  ;;  %v3981_v60 = vld [vmem:[#allocation5 + $0x2e4] ss:$16 sps:$4 sm:$0xff]  }
  0xc8   :  { %1703 = vmatprep.subr.bf16.mxu1 %v3834_v62  ;;  %v3921_v61 = vld [vmem:[#allocation5 + $0x64] ss:$16 sps:$4 sm:$0xff]   ;;  %v3985_v62 = vld [vmem:[#allocation5 + $0x2c0] ss:$16 sps:$4 sm:$0xff]  }
  0xca   :  { %1679 = vmatpush2.bf16.msra.mxu0 %v3829_v47  ;;  %v3987_v47 = vld [vmem:[#allocation5 + $0x2c4] ss:$16 sps:$4 sm:$0xff]  }
  0xcb   :  { %1704 = vmatpush1.bf16.msra.mxu1 %v3832_v6  ;;  %1680 = vmatprep.subr.bf16.mxu0 %v3837_v63  ;;  %v3924_v6 = vld [vmem:[#allocation5 + $0x44] ss:$16 sps:$4 sm:$0xff]   ;;  %v3922_v63 = vld [vmem:[#allocation5 + $0x40] ss:$16 sps:$4 sm:$0xff]  }
  0xcc   :  { %1705 = vmatprep.subr.bf16.mxu1 %v3840_v0  ;;  %v3991_v0 = vld [vmem:[#allocation5 + $0x2a0] ss:$16 sps:$4 sm:$0xff]  }
  0xce   :  { %1681 = vmatpush2.bf16.msra.mxu0 %v3835_v1  ;;  %v3993_v1 = vld [vmem:[#allocation5 + $0x2a4] ss:$16 sps:$4 sm:$0xff]  }
  0xcf   :  { %1706 = vmatpush1.bf16.msra.mxu1 %v3838_v2  ;;  %1682 = vmatprep.subr.bf16.mxu0 %v3843_v3  ;;  %v3927_v2 = vld [vmem:[#allocation5 + $0x24] ss:$16 sps:$4 sm:$0xff]   ;;  %v3925_v3 = vld [vmem:[#allocation5 + $0x20] ss:$16 sps:$4 sm:$0xff]  }
  0xd0   :  { %1707 = vmatprep.subr.bf16.mxu1 %v3846_v4  ;;  %v3997_v4 = vld [vmem:[#allocation5 + $0x280] ss:$16 sps:$4 sm:$0xff]  }
  0xd2   :  { %1683 = vmatpush2.bf16.msra.mxu0 %v3841_v35  ;;  %v3999_v35 = vld [vmem:[#allocation5 + $0x284] ss:$16 sps:$4 sm:$0xff]  }
  0xd3   :  { %1708 = vmatpush1.bf16.msra.mxu1 %v3844_v5  ;;  %1684 = vmatprep.subr.bf16.mxu0 %v3849_v8  ;;  %v3930_v5 = vld [vmem:[#allocation5 + $0x4] ss:$16 sps:$4 sm:$0xff]   ;;  %v3928_v8 = vld [vmem:[#allocation5] ss:$16 sps:$4 sm:$0xff]  }
  0xd4   :  { %1709 = vmatprep.subr.bf16.mxu1 %v3852_v9  ;;  %v4003_v9 = vld [vmem:[#allocation5 + $0x260] ss:$16 sps:$4 sm:$0xff]  }
  0xd6   :  { %1685 = vmatpush2.bf16.msra.mxu0 %v3847_v10  ;;  %v4005_v10 = vld [vmem:[#allocation5 + $0x264] ss:$16 sps:$4 sm:$0xff]  }
  0xd7   :  { %1710 = vmatpush1.bf16.msra.mxu1 %v3850_v11  ;;  %1686 = vmatprep.subr.bf16.mxu0 %v3855_v12  ;;  %v3933_v11 = vld [vmem:[#allocation5 + $0x1e4] ss:$16 sps:$4 sm:$0xff]   ;;  %v3931_v12 = vld [vmem:[#allocation5 + $0x1e0] ss:$16 sps:$4 sm:$0xff]  }
  0xd8   :  { %1711 = vmatprep.subr.bf16.mxu1 %v3858_v13  ;;  %v4009_v13 = vld [vmem:[#allocation5 + $0x240] ss:$16 sps:$4 sm:$0xff]  }
  0xda   :  { %1687 = vmatpush2.bf16.msra.mxu0 %v3853_v14  ;;  %v4011_v14 = vld [vmem:[#allocation5 + $0x244] ss:$16 sps:$4 sm:$0xff]  }
  0xdb   :  { %1712 = vmatpush1.bf16.msra.mxu1 %v3856_v17  ;;  %1738 = vmatprep.subr.bf16.mxu0 %v3864_v19  ;;  %v3936_v17 = vld [vmem:[#allocation5 + $0x1c4] ss:$16 sps:$4 sm:$0xff]  }
  0xdc   :  { %1713 = vmatprep.subr.bf16.mxu1 %v3861_v18 }
  0xdd   :  { %1689 = vmatmul.mubr.bf16.vlgmr.msra.gmra.mxu0 %v4268_v7  ;;  %v3885_v7 = vld [vmem:[#allocation2 + $0x56c] ss:$16 sps:$4 sm:$0xff]  }
  0xde   :  { %1739 = vmatpush1.bf16.msra.mxu0 %v3862_v21  ;;  %1770 = vmatprep.mubr.bf16.mxu0 %v4206_v16  ;;  %v3894_v16 = vld [vmem:[#allocation2 + $0x64c] ss:$16 sps:$4 sm:$0xff]  }
  0xdf   :  { %1714 = vmatpush2.bf16.msra.mxu1 %v3859_v20  ;;  %1740 = vmatprep.subr.bf16.mxu0 %v3870_v23  ;;  %v3934_v20 = vld [vmem:[#allocation5 + $0x1c0] ss:$16 sps:$4 sm:$0xff]   ;;  %v3939_v23 = vld [vmem:[#allocation5 + $0x1a4] ss:$16 sps:$4 sm:$0xff]  }
  0xe0   :  { %1715 = vmatprep.subr.bf16.mxu1 %v3867_v22 }
  0xe2   :  { %1741 = vmatpush1.bf16.msra.mxu0 %v3868_v25  ;;  %v4015_v25 = vld [vmem:[#allocation5 + $0x220] ss:$16 sps:$4 sm:$0xff]  }
  0xe3   :  { %1716 = vmatpush2.bf16.msra.mxu1 %v3865_v24  ;;  %1742 = vmatprep.subr.bf16.mxu0 %v3876_v27  ;;  %v4017_v24 = vld [vmem:[#allocation5 + $0x224] ss:$16 sps:$4 sm:$0xff]  }
  0xe4   :  { %1717 = vmatprep.subr.bf16.mxu1 %v3873_v26 }
  0xe6   :  { %1743 = vmatpush1.bf16.msra.mxu0 %v3874_v29 }
  0xe7   :  { %1718 = vmatpush2.bf16.msra.mxu1 %v3871_v28  ;;  %1744 = vmatprep.subr.bf16.mxu0 %v3882_v31  ;;  %v3937_v28 = vld [vmem:[#allocation5 + $0x1a0] ss:$16 sps:$4 sm:$0xff]   ;;  %v3942_v31 = vld [vmem:[#allocation5 + $0x184] ss:$16 sps:$4 sm:$0xff]  }
  0xe8   :  { %1719 = vmatprep.subr.bf16.mxu1 %v3879_v30 }
  0xea   :  { %1745 = vmatpush1.bf16.msra.mxu0 %v3880_v33  ;;  %v4023_v33 = vld [vmem:[#allocation5 + $0x204] ss:$16 sps:$4 sm:$0xff]  }
  0xeb   :  { %1720 = vmatpush2.bf16.msra.mxu1 %v3877_v32  ;;  %1746 = vmatprep.subr.bf16.mxu0 %v3888_v51  ;;  %v4021_v32 = vld [vmem:[#allocation5 + $0x200] ss:$16 sps:$4 sm:$0xff]  }
  0xec   :  { %1721 = vmatprep.subr.bf16.mxu1 %v3885_v7  ;;  %v3940_v7 = vld [vmem:[#allocation5 + $0x180] ss:$16 sps:$4 sm:$0xff]  }
  0xed   :  { %v4027_v51 = vld [vmem:[#allocation5 + $0x3e0] ss:$16 sps:$4 sm:$0xff]  }
  0xee   :  { %1747 = vmatpush1.bf16.msra.mxu0 %v3886_v36  ;;  %v3945_v36 = vld [vmem:[#allocation5 + $0x164] ss:$16 sps:$4 sm:$0xff]  }
  0xef   :  { %1722 = vmatpush2.bf16.msra.mxu1 %v3883_v34  ;;  %1748 = vmatprep.subr.bf16.mxu0 %v3894_v16  ;;  %v4029_v34 = vld [vmem:[#allocation5 + $0x3e4] ss:$16 sps:$4 sm:$0xff]   ;;  %v3943_v16 = vld [vmem:[#allocation5 + $0x160] ss:$16 sps:$4 sm:$0xff]  }
  0xf0   :  { %1723 = vmatprep.subr.bf16.mxu1 %v3891_v37  ;;  %v4032_v37 = vld [vmem:[#allocation5 + $0x3c4] ss:$16 sps:$4 sm:$0xff]  }
  0xf2   :  { %1749 = vmatpush1.bf16.msra.mxu0 %v3892_v39  ;;  %v3948_v39 = vld [vmem:[#allocation5 + $0x144] ss:$16 sps:$4 sm:$0xff]  }
  0xf3   :  { %1724 = vmatpush2.bf16.msra.mxu1 %v3889_v38  ;;  %1750 = vmatprep.subr.bf16.mxu0 %v3900_v41  ;;  %v4030_v38 = vld [vmem:[#allocation5 + $0x3c0] ss:$16 sps:$4 sm:$0xff]  }
  0xf4   :  { %1725 = vmatprep.subr.bf16.mxu1 %v3897_v40  ;;  %v4035_v40 = vld [vmem:[#allocation5 + $0x3a4] ss:$16 sps:$4 sm:$0xff]   ;;  %v3946_v41 = vld [vmem:[#allocation5 + $0x140] ss:$16 sps:$4 sm:$0xff]  }
  0xf6   :  { %1751 = vmatpush1.bf16.msra.mxu0 %v3898_v43  ;;  %v3951_v43 = vld [vmem:[#allocation5 + $0x124] ss:$16 sps:$4 sm:$0xff]  }
  0xf7   :  { %1726 = vmatpush2.bf16.msra.mxu1 %v3895_v42  ;;  %1752 = vmatprep.subr.bf16.mxu0 %v3906_v45  ;;  %v4033_v42 = vld [vmem:[#allocation5 + $0x3a0] ss:$16 sps:$4 sm:$0xff]  }
  0xf8   :  { %1727 = vmatprep.subr.bf16.mxu1 %v3903_v44  ;;  %v4038_v44 = vld [vmem:[#allocation5 + $0x384] ss:$16 sps:$4 sm:$0xff]   ;;  %v3949_v45 = vld [vmem:[#allocation5 + $0x120] ss:$16 sps:$4 sm:$0xff]  }
  0xfa   :  { %1753 = vmatpush1.bf16.msra.mxu0 %v3904_v48  ;;  %v3954_v48 = vld [vmem:[#allocation5 + $0x104] ss:$16 sps:$4 sm:$0xff]  }
  0xfb   :  { %1728 = vmatpush2.bf16.msra.mxu1 %v3901_v46  ;;  %2577 = vmatprep.subr.bf16.mxu0 %v3909_v49  ;;  %v4036_v46 = vld [vmem:[#allocation5 + $0x380] ss:$16 sps:$4 sm:$0xff]   ;;  %v4041_v49 = vld [vmem:[#allocation5 + $0x364] ss:$16 sps:$4 sm:$0xff]  }
  0xfc   :  { %2618 = vmatprep.subr.bf16.mxu1 %v3981_v60 }
  0xfd   :  { %1771 = vmatmul.mubr.bf16.vlgmr.msra.gmra.mxu0 %v4135_v53  ;;  %v3957_v53 = vld [vmem:[#allocation5 + $0xec] ss:$16 sps:$4 sm:$0xff]  }
  0xfe   :  { %1730 = vmatmul.mubr.bf16.vlgmr.msra.gmra.mxu1 %v4289_v15  ;;  %2578 = vmatpush1.bf16.msra.mxu0 %v3907_v50  ;;  %v3919_v15 = vld [vmem:[#allocation5 + $0x60] ss:$16 sps:$4 sm:$0xff]  }
  0xff   :  { %2579 = vmatprep.subr.bf16.mxu0 %v3912_v52  ;;  %2619 = vmatpush1.bf16.msra.mxu1 %v3979_v59  ;;  %v3952_v50 = vld [vmem:[#allocation5 + $0x100] ss:$16 sps:$4 sm:$0xff]  }
 0x100   :  { %2620 = vmatprep.subr.bf16.mxu1 %v3987_v47  ;;  %v4039_v52 = vld [vmem:[#allocation5 + $0x360] ss:$16 sps:$4 sm:$0xff]   ;;  %v4053_v47 = vld [vmem:[#allocation5 + $0x2ec] ss:$16 sps:$4 sm:$0xff]  }
 0x101   :  { %v4045_v59 = vld [vmem:[#allocation5 + $0x320] ss:$16 sps:$4 sm:$0xff]  }
 0x102   :  { %2580 = vmatpush1.bf16.msra.mxu0 %v3910_v54  ;;  %v4044_v54 = vld [vmem:[#allocation5 + $0x344] ss:$16 sps:$4 sm:$0xff]  }
 0x103   :  { %2581 = vmatprep.subr.bf16.mxu0 %v3915_v55  ;;  %2621 = vmatpush1.bf16.msra.mxu1 %v3985_v62  ;;  %v4042_v55 = vld [vmem:[#allocation5 + $0x340] ss:$16 sps:$4 sm:$0xff]  }
 0x104   :  { %2622 = vmatprep.subr.bf16.mxu1 %v3993_v1  ;;  %v4048_v62 = vld [vmem:[#allocation5 + $0x300] ss:$16 sps:$4 sm:$0xff]  }
 0x105   :  { %v4315_v1 = vld [vmem:[%s4462_s2] sm:$0xf] }
 0x106   :  { %2582 = vmatpush1.bf16.msra.mxu0 %v3913_v56 }
 0x107   :  { %2583 = vmatprep.subr.bf16.mxu0 %v3918_v57  ;;  %2623 = vmatpush1.bf16.msra.mxu1 %v3991_v0 }
 0x108   :  { %2624 = vmatprep.subr.bf16.mxu1 %v3999_v35 }
 0x10a   :  { %2584 = vmatpush1.bf16.msra.mxu0 %v3916_v58  ;;  %v4047_v58 = vld [vmem:[#allocation5 + $0x324] ss:$16 sps:$4 sm:$0xff]  }
 0x10b   :  { %2585 = vmatprep.subr.bf16.mxu0 %v3921_v61  ;;  %2625 = vmatpush1.bf16.msra.mxu1 %v3997_v4 }
 0x10c   :  { %2626 = vmatprep.subr.bf16.mxu1 %v4005_v10 }
 0x10e   :  { %2586 = vmatpush1.bf16.msra.mxu0 %v3919_v15  ;;  %v4050_v15 = vld [vmem:[#allocation5 + $0x304] ss:$16 sps:$4 sm:$0xff]  }
 0x10f   :  { %2587 = vmatprep.subr.bf16.mxu0 %v3924_v6  ;;  %2627 = vmatpush1.bf16.msra.mxu1 %v4003_v9  ;;  %v286_v6 = vlaneseq }
 0x110   :  { %2628 = vmatprep.subr.bf16.mxu1 %v4011_v14 }
 0x112   :  { %2588 = vmatpush1.bf16.msra.mxu0 %v3922_v63  ;;  %v4309_v63 = vshrl.u32 %v286_v6, 7 }
 0x113   :  { %2589 = vmatprep.subr.bf16.mxu0 %v3927_v2  ;;  %2629 = vmatpush1.bf16.msra.mxu1 %v4009_v13 }
 0x114   :  { %2630 = vmatprep.subr.bf16.mxu1 %v4017_v24  ;;  %v288_v0 = vsub.s32 0, %v4309_v63  ;;  %v292_v2 = vsub.s32 1, %v4309_v63 }
 0x116   :  { %2590 = vmatpush1.bf16.msra.mxu0 %v3925_v3  ;;  %v289_v3 = vrot.slane %v4315_v1, %v288_v0  ;;  %v293_v4 = vrot.slane %v4315_v1, %v292_v2 }
 0x117   :  { %2591 = vmatprep.subr.bf16.mxu0 %v3930_v5  ;;  %2631 = vmatpush1.bf16.msra.mxu1 %v4015_v25 }
 0x118   :  { %2632 = vmatprep.subr.bf16.mxu1 %v4023_v33  ;;  %v3972_v33 = vld [vmem:[#allocation5 + $0x4c] ss:$16 sps:$4 sm:$0xff]  }
 0x11a   :  { %2592 = vmatpush1.bf16.msra.mxu0 %v3928_v8 }
 0x11b   :  { %2593 = vmatprep.subr.bf16.mxu0 %v3933_v11  ;;  %2633 = vmatpush1.bf16.msra.mxu1 %v4021_v32  ;;  %v3967_v32 = vld [vmem:[#allocation5 + $0x68] ss:$16 sps:$4 sm:$0xff]  }
 0x11c   :  { %2634 = vmatprep.subr.bf16.mxu1 %v4029_v34 }
 0x11d   :  { %v4301_v18 = vpop.f32.mrf.mxu0 }
 0x11e   :  { %v4303_v19 = vpop.f32.mrf.mxu1  ;;  %2594 = vmatpush2.bf16.msra.mxu0 %v3931_v12  ;;  %v1486_v35 = vadd.f32 %v4301_v18, %v289_v3  ;;  %v3960_v18 = vld [vmem:[#allocation5 + $0xcc] ss:$16 sps:$4 sm:$0xff]  }
 0x11f   :  { %v4305_v21 = vpop.f32.mrf.mxu0  ;;  %2595 = vmatprep.subr.bf16.mxu0 %v3936_v17  ;;  %2635 = vmatpush2.bf16.msra.mxu1 %v4027_v51  ;;  %v3975_v51 = vld [vmem:[#allocation5 + $0x2c] ss:$16 sps:$4 sm:$0xff]  }
 0x120   :  { %v4307_v22 = vpop.f32.mrf.mxu1  ;;  %2636 = vmatprep.subr.bf16.mxu1 %v4032_v37  ;;  %v1488_v5 = vadd.f32 %v4305_v21, %v293_v4  ;;  %v1527_v8 = vadd.f32 %v4303_v19, %v1486_v35  ;;  %v3958_v19 = vld [vmem:[#allocation5 + $0xc8] ss:$16 sps:$4 sm:$0xff]   ;;  %v3963_v21 = vld [vmem:[#allocation5 + $0xac] ss:$16 sps:$4 sm:$0xff]  }
 0x121   :  { %v1489_v26 = vpop.f32.mrf.mxu0 }
 0x122   :  { %v1530_v27 = vpop.f32.mrf.mxu1  ;;  %2596 = vmatpush2.bf16.msra.mxu0 %v3934_v20  ;;  %v1529_v10 = vadd.f32 %v4307_v22, %v1488_v5  ;;  %v3961_v22 = vld [vmem:[#allocation5 + $0xa8] ss:$16 sps:$4 sm:$0xff]  }
 0x123   :  { %v1490_v29 = vpop.f32.mrf.mxu0  ;;  %2597 = vmatprep.subr.bf16.mxu0 %v3939_v23  ;;  %2637 = vmatpush2.bf16.msra.mxu1 %v4030_v38  ;;  %v3955_v27 = vld [vmem:[#allocation5 + $0xe8] ss:$16 sps:$4 sm:$0xff]  }
 0x124   :  { %v1531_v30 = vpop.f32.mrf.mxu1  ;;  %2638 = vmatprep.subr.bf16.mxu1 %v4035_v40  ;;  %v3966_v29 = vld [vmem:[#allocation5 + $0x8c] ss:$16 sps:$4 sm:$0xff]  }
 0x125   :  { %v3964_v30 = vld [vmem:[#allocation5 + $0x88] ss:$16 sps:$4 sm:$0xff]  }
 0x126   :  { %2598 = vmatpush2.bf16.msra.mxu0 %v3937_v28 }
 0x127   :  { %2599 = vmatprep.subr.bf16.mxu0 %v3942_v31  ;;  %2639 = vmatpush2.bf16.msra.mxu1 %v4033_v42  ;;  %v3969_v31 = vld [vmem:[#allocation5 + $0x6c] ss:$16 sps:$4 sm:$0xff]   ;;  %v3982_v42 = vld [vmem:[#allocation5 + $0x1e8] ss:$16 sps:$4 sm:$0xff]  }
 0x128   :  { %2640 = vmatprep.subr.bf16.mxu1 %v4038_v44  ;;  %v3988_v44 = vld [vmem:[#allocation5 + $0x1c8] ss:$16 sps:$4 sm:$0xff]  }
 0x12a   :  { %2600 = vmatpush2.bf16.msra.mxu0 %v3940_v7  ;;  %v3970_v7 = vld [vmem:[#allocation5 + $0x48] ss:$16 sps:$4 sm:$0xff]  }
 0x12b   :  { %2601 = vmatprep.subr.bf16.mxu0 %v3945_v36  ;;  %2641 = vmatpush2.bf16.msra.mxu1 %v4036_v46  ;;  %v3973_v36 = vld [vmem:[#allocation5 + $0x28] ss:$16 sps:$4 sm:$0xff]  }
 0x12c   :  { %2642 = vmatprep.subr.bf16.mxu1 %v4041_v49  ;;  %v3994_v46 = vld [vmem:[#allocation5 + $0x1a8] ss:$16 sps:$4 sm:$0xff]  }
 0x12d   :  { %v4000_v49 = vld [vmem:[#allocation5 + $0x188] ss:$16 sps:$4 sm:$0xff]  }
 0x12e   :  { %2602 = vmatpush2.bf16.msra.mxu0 %v3943_v16  ;;  %v3978_v16 = vld [vmem:[#allocation5 + $0xc] ss:$16 sps:$4 sm:$0xff]  }
 0x12f   :  { %2603 = vmatprep.subr.bf16.mxu0 %v3948_v39  ;;  %2643 = vmatpush2.bf16.msra.mxu1 %v4039_v52  ;;  %v3976_v39 = vld [vmem:[#allocation5 + $0x8] ss:$16 sps:$4 sm:$0xff]  }
 0x130   :  { %2644 = vmatprep.subr.bf16.mxu1 %v4044_v54  ;;  %v4006_v52 = vld [vmem:[#allocation5 + $0x168] ss:$16 sps:$4 sm:$0xff]  }
 0x131   :  { %v4012_v54 = vld [vmem:[#allocation5 + $0x148] ss:$16 sps:$4 sm:$0xff]  }
 0x132   :  { %2604 = vmatpush2.bf16.msra.mxu0 %v3946_v41  ;;  %v3984_v41 = vld [vmem:[#allocation5 + $0x1ec] ss:$16 sps:$4 sm:$0xff]  }
 0x133   :  { %2605 = vmatprep.subr.bf16.mxu0 %v3951_v43  ;;  %2645 = vmatpush2.bf16.msra.mxu1 %v4042_v55  ;;  %v3990_v43 = vld [vmem:[#allocation5 + $0x1cc] ss:$16 sps:$4 sm:$0xff]  }
 0x134   :  { %2646 = vmatprep.subr.bf16.mxu1 %v4047_v58  ;;  %v4020_v55 = vld [vmem:[#allocation5 + $0x12c] ss:$16 sps:$4 sm:$0xff]  }
 0x136   :  { %2606 = vmatpush2.bf16.msra.mxu0 %v3949_v45  ;;  %v3996_v45 = vld [vmem:[#allocation5 + $0x1ac] ss:$16 sps:$4 sm:$0xff]  }
 0x137   :  { %2607 = vmatprep.subr.bf16.mxu0 %v3954_v48  ;;  %2647 = vmatpush2.bf16.msra.mxu1 %v4045_v59  ;;  %v4002_v48 = vld [vmem:[#allocation5 + $0x18c] ss:$16 sps:$4 sm:$0xff]  }
 0x138   :  { %2648 = vmatprep.subr.bf16.mxu1 %v4050_v15  ;;  %v4026_v59 = vld [vmem:[#allocation5 + $0x10c] ss:$16 sps:$4 sm:$0xff]  }
 0x13a   :  { %2608 = vmatpush2.bf16.msra.mxu0 %v3952_v50  ;;  %v4008_v50 = vld [vmem:[#allocation5 + $0x16c] ss:$16 sps:$4 sm:$0xff]  }
 0x13b   :  { %2659 = vmatprep.subr.bf16.mxu0 %v3957_v53  ;;  %2649 = vmatpush2.bf16.msra.mxu1 %v4048_v62  ;;  %v4014_v53 = vld [vmem:[#allocation5 + $0x14c] ss:$16 sps:$4 sm:$0xff]   ;;  %v296_v62 = vsub.s32 2, %v4309_v63 }
 0x13c   :  { %2700 = vmatprep.subr.bf16.mxu1 %v4053_v47  ;;  %v300_v47 = vsub.s32 3, %v4309_v63 }
 0x13d   :  { %v297_v6 = vrot.slane %v4315_v1, %v296_v62 }
 0x13e   :  { %v1608_v56 = vpop.f32.mrf.mxu1  ;;  %v301_v3 = vrot.slane %v4315_v1, %v300_v47  ;;  %v4051_v1 = vld [vmem:[#allocation5 + $0x2e8] ss:$16 sps:$4 sm:$0xff]  }
 0x140   :  { %v1610_v57 = vpop.f32.mrf.mxu1 }
 0x142   :  { %v1612_v60 = vpop.f32.mrf.mxu1 }
 0x144   :  { %v1613_v61 = vpop.f32.mrf.mxu1 }
 0x145   :  { %v4024_v61 = vld [vmem:[#allocation5 + $0x108] ss:$16 sps:$4 sm:$0xff]  }
 0x15d   :  { %v1567_v9 = vpop.f32.mrf.mxu0 }
 0x15e   :  { %v1568_v11 = vadd.f32 %v1567_v9, %v1527_v8 }
 0x15f   :  { %v1569_v12 = vpop.f32.mrf.mxu0 }
 0x160   :  { %v1609_v13 = vadd.f32 %v1608_v56, %v1568_v11  ;;  %v1570_v14 = vadd.f32 %v1569_v12, %v1529_v10 }
 0x161   :  { %v1571_v17 = vpop.f32.mrf.mxu0 }
 0x162   :  { %v1611_v20 = vadd.f32 %v1610_v57, %v1570_v14  ;;  %v1779_v23 = vmax.f32 %v1609_v13, 0.0  ;;  %v4018_v57 = vld [vmem:[#allocation5 + $0x128] ss:$16 sps:$4 sm:$0xff]  }
 0x163   :  { %v1572_v24 = vpop.f32.mrf.mxu0 }
 0x164   :  { %v1780_v25 = vmax.f32 %v1611_v20, 0.0  ;;  %v4328_v28 = vpack.c.bf16 %v1779_v23, %v1779_v23 }
 0x166   :  { %v1784_v26 = vpack.c.bf16 %v1780_v25, %v1780_v25 }
 0x168   :  { %2609 = vmatprep.mubr.bf16.mxu0 %v1784_v26 }
 0x169   :  { %2610 = vmatmul.mubr.bf16.vlgmr.msra.gmra.mxu0 %v4328_v28 }
 0x16a   :  { %2660 = vmatpush1.bf16.msra.mxu0 %v3955_v27  ;;  %2691 = vmatprep.mubr.bf16.mxu0 %v1784_v26 }
 0x16b   :  { %2661 = vmatprep.subr.bf16.mxu0 %v3960_v18 }
 0x16e   :  { %2662 = vmatpush1.bf16.msra.mxu0 %v3958_v19 }
 0x16f   :  { %2663 = vmatprep.subr.bf16.mxu0 %v3963_v21  ;;  %v4056_v21 = vld [vmem:[#allocation5 + $0x2cc] ss:$16 sps:$4 sm:$0xff]  }
 0x172   :  { %2664 = vmatpush1.bf16.msra.mxu0 %v3961_v22  ;;  %v4054_v22 = vld [vmem:[#allocation5 + $0x2c8] ss:$16 sps:$4 sm:$0xff]  }
 0x173   :  { %2665 = vmatprep.subr.bf16.mxu0 %v3966_v29  ;;  %v4059_v29 = vld [vmem:[#allocation5 + $0x2ac] ss:$16 sps:$4 sm:$0xff]  }
 0x176   :  { %2666 = vmatpush1.bf16.msra.mxu0 %v3964_v30  ;;  %v4057_v30 = vld [vmem:[#allocation5 + $0x2a8] ss:$16 sps:$4 sm:$0xff]  }
 0x177   :  { %2667 = vmatprep.subr.bf16.mxu0 %v3969_v31  ;;  %v4062_v31 = vld [vmem:[#allocation5 + $0x28c] ss:$16 sps:$4 sm:$0xff]  }
 0x17a   :  { %2668 = vmatpush1.bf16.msra.mxu0 %v3967_v32  ;;  %v4060_v32 = vld [vmem:[#allocation5 + $0x288] ss:$16 sps:$4 sm:$0xff]  }
 0x17b   :  { %2669 = vmatprep.subr.bf16.mxu0 %v3972_v33  ;;  %v4065_v33 = vld [vmem:[#allocation5 + $0x26c] ss:$16 sps:$4 sm:$0xff]  }
 0x17e   :  { %v1649_v34 = vpop.f32.mrf.mxu1  ;;  %2670 = vmatpush1.bf16.msra.mxu0 %v3970_v7  ;;  %v4063_v7 = vld [vmem:[#allocation5 + $0x268] ss:$16 sps:$4 sm:$0xff]  }
 0x17f   :  { %2671 = vmatprep.subr.bf16.mxu0 %v3975_v51  ;;  %v1650_v4 = vadd.f32 %v1649_v34, %v297_v6  ;;  %v4068_v51 = vld [vmem:[#allocation5 + $0x24c] ss:$16 sps:$4 sm:$0xff]   ;;  %v4066_v34 = vld [vmem:[#allocation5 + $0x248] ss:$16 sps:$4 sm:$0xff]  }
 0x180   :  { %v1651_v37 = vpop.f32.mrf.mxu1  ;;  %v4093_v6 = vld [vmem:[#allocation5 + $0x328] ss:$16 sps:$4 sm:$0xff]  }
 0x181   :  { %v1652_v35 = vadd.f32 %v1651_v37, %v301_v3  ;;  %v4069_v37 = vld [vmem:[#allocation5 + $0x228] ss:$16 sps:$4 sm:$0xff]  }
 0x182   :  { %v1653_v38 = vpop.f32.mrf.mxu1  ;;  %2672 = vmatpush1.bf16.msra.mxu0 %v3973_v36  ;;  %v4071_v36 = vld [vmem:[#allocation5 + $0x22c] ss:$16 sps:$4 sm:$0xff]  }
 0x183   :  { %2673 = vmatprep.subr.bf16.mxu0 %v3978_v16  ;;  %v4074_v16 = vld [vmem:[#allocation5 + $0x20c] ss:$16 sps:$4 sm:$0xff]   ;;  %v4072_v38 = vld [vmem:[#allocation5 + $0x208] ss:$16 sps:$4 sm:$0xff]  }
 0x184   :  { %v1654_v40 = vpop.f32.mrf.mxu1  ;;  %v4108_v3 = vld [vmem:[%s4465_s5 + $0x18] sm:$0xff]  }
 0x185   :  { %v4075_v40 = vld [vmem:[#allocation5 + $0x3e8] ss:$16 sps:$4 sm:$0xff]  }
 0x186   :  { %2674 = vmatpush1.bf16.msra.mxu0 %v3976_v39  ;;  %v4077_v39 = vld [vmem:[#allocation5 + $0x3ec] ss:$16 sps:$4 sm:$0xff]  }
 0x187   :  { %2675 = vmatprep.subr.bf16.mxu0 %v3984_v41  ;;  %v4080_v41 = vld [vmem:[#allocation5 + $0x3cc] ss:$16 sps:$4 sm:$0xff]  }
 0x18a   :  { %2676 = vmatpush2.bf16.msra.mxu0 %v3982_v42  ;;  %v4078_v42 = vld [vmem:[#allocation5 + $0x3c8] ss:$16 sps:$4 sm:$0xff]  }
 0x18b   :  { %2677 = vmatprep.subr.bf16.mxu0 %v3990_v43  ;;  %v4083_v43 = vld [vmem:[#allocation5 + $0x3ac] ss:$16 sps:$4 sm:$0xff]  }
 0x18e   :  { %2678 = vmatpush2.bf16.msra.mxu0 %v3988_v44  ;;  %v4081_v44 = vld [vmem:[#allocation5 + $0x3a8] ss:$16 sps:$4 sm:$0xff]  }
 0x18f   :  { %2679 = vmatprep.subr.bf16.mxu0 %v3996_v45  ;;  %v4086_v45 = vld [vmem:[#allocation5 + $0x38c] ss:$16 sps:$4 sm:$0xff]  }
 0x192   :  { %2680 = vmatpush2.bf16.msra.mxu0 %v3994_v46  ;;  %v4099_v46 = vld [vmem:[%s4465_s5 + $0x78] sm:$0xff]  }
 0x193   :  { %2681 = vmatprep.subr.bf16.mxu0 %v4002_v48  ;;  %v4100_v48 = vld [vmem:[%s4465_s5 + $0x38] sm:$0xff]  }
 0x196   :  { %2682 = vmatpush2.bf16.msra.mxu0 %v4000_v49  ;;  %v4101_v49 = vld [vmem:[%s4465_s5 + $0x70] sm:$0xff]  }
 0x197   :  { %2683 = vmatprep.subr.bf16.mxu0 %v4008_v50  ;;  %v4084_v50 = vld [vmem:[#allocation5 + $0x388] ss:$16 sps:$4 sm:$0xff]  }
 0x19a   :  { %2684 = vmatpush2.bf16.msra.mxu0 %v4006_v52  ;;  %v4102_v52 = vld [vmem:[%s4465_s5 + $0x30] sm:$0xff]  }
 0x19b   :  { %2685 = vmatprep.subr.bf16.mxu0 %v4014_v53  ;;  %v4089_v53 = vld [vmem:[#allocation5 + $0x36c] ss:$16 sps:$4 sm:$0xff]  }
 0x19d   :  { %v1690_v56 = vpop.f32.mrf.mxu0 }
 0x19e   :  { %2686 = vmatpush2.bf16.msra.mxu0 %v4012_v54  ;;  %v1691_v5 = vadd.f32 %v1690_v56, %v1650_v4  ;;  %v4103_v54 = vld [vmem:[%s4465_s5 + $0x68] sm:$0xff]  }
 0x19f   :  { %v1692_v58 = vpop.f32.mrf.mxu0  ;;  %2687 = vmatprep.subr.bf16.mxu0 %v4020_v55  ;;  %v4087_v55 = vld [vmem:[#allocation5 + $0x368] ss:$16 sps:$4 sm:$0xff]   ;;  %v4098_v4 = vld [vmem:[#allocation5 + $0x30c] ss:$16 sps:$4 sm:$0xff]  }
 0x1a0   :  { %v1693_v10 = vadd.f32 %v1692_v58, %v1652_v35  ;;  %v4104_v56 = vld [vmem:[%s4465_s5 + $0x28] sm:$0xff]   ;;  %v4105_v58 = vld [vmem:[%s4465_s5 + $0x60] sm:$0xff]   ;;  %v4109_v35 = vld [vmem:[%s4465_s5 + $0x50] sm:$0xff]  }
 0x1a1   :  { %v1694_v60 = vpop.f32.mrf.mxu0 }
 0x1a2   :  { %2688 = vmatpush2.bf16.msra.mxu0 %v4018_v57  ;;  %v4092_v57 = vld [vmem:[#allocation5 + $0x34c] ss:$16 sps:$4 sm:$0xff]   ;;  %v4106_v60 = vld [vmem:[%s4465_s5 + $0x20] sm:$0xff]  }
 0x1a3   :  { %v1695_v15 = vpop.f32.mrf.mxu0  ;;  %2689 = vmatprep.subr.bf16.mxu0 %v4026_v59  ;;  %v4090_v59 = vld [vmem:[#allocation5 + $0x348] ss:$16 sps:$4 sm:$0xff]  }
 0x1a4   :  { %v4107_v15 = vld [vmem:[%s4465_s5 + $0x58] sm:$0xff]  }
 0x1a6   :  { %2690 = vmatpush2.bf16.msra.mxu0 %v4024_v61  ;;  %v4095_v61 = vld [vmem:[#allocation5 + $0x32c] ss:$16 sps:$4 sm:$0xff]  }
 0x1a7   :  { %3514 = vmatprep.subr.bf16.mxu0 %v4099_v46 }
 0x1a9   :  { %2692 = vmatmul.mubr.bf16.vlgmr.msra.gmra.mxu0 %v4328_v28 }
 0x1aa   :  { %3515 = vmatpush3.bf16.msra.mxu0 %v4100_v48 }
 0x1ab   :  { %3516 = vmatprep.subr.bf16.mxu0 %v4101_v49 }
 0x1ae   :  { %3517 = vmatpush3.bf16.msra.mxu0 %v4102_v52 }
 0x1af   :  { %3518 = vmatprep.subr.bf16.mxu0 %v4103_v54 }
 0x1b2   :  { %3519 = vmatpush3.bf16.msra.mxu0 %v4104_v56 }
 0x1b3   :  { %3520 = vmatprep.subr.bf16.mxu0 %v4105_v58 }
 0x1b6   :  { %3521 = vmatpush3.bf16.msra.mxu0 %v4106_v60 }
 0x1b7   :  { %3522 = vmatprep.subr.bf16.mxu0 %v4107_v15 }
 0x1ba   :  { %3523 = vmatpush3.bf16.msra.mxu0 %v4108_v3 }
 0x1bb   :  { %3524 = vmatprep.subr.bf16.mxu0 %v4109_v35 }
 0x1bd   :  { %v1772_v9 = vpop.f32.mrf.mxu0 }
 0x1be   :  { %v1731_v8 = vpop.f32.mrf.mxu1 }
 0x1bf   :  { %v1732_v11 = vadd.f32 %v1731_v8, %v1691_v5  ;;  %v1774_v13 = vpop.f32.mrf.mxu0  ;;  %v4096_v5 = vld [vmem:[#allocation5 + $0x308] ss:$16 sps:$4 sm:$0xff]   ;;  %v4110_v8 = vld [vmem:[%s4465_s5 + $0x10] sm:$0xff]  }
 0x1c0   :  { %v1733_v12 = vpop.f32.mrf.mxu1  ;;  %3525 = vmatpush3.bf16.msra.mxu0 %v4110_v8 }
 0x1c1   :  { %v1773_v14 = vadd.f32 %v1772_v9, %v1732_v11  ;;  %v1734_v17 = vadd.f32 %v1733_v12, %v1693_v10  ;;  %v1776_v23 = vpop.f32.mrf.mxu0  ;;  %v4111_v9 = vld [vmem:[%s4465_s5 + $0x48] sm:$0xff]   ;;  %v4113_v11 = vld [vmem:[%s4465_s5 + $0x40] sm:$0xff]  }
 0x1c2   :  { %v1735_v20 = vpop.f32.mrf.mxu1  ;;  %v4112_v10 = vld [vmem:[%s4465_s5 + $0x8] sm:$0xff]   ;;  %3526 = vmatprep.subr.bf16.mxu0 %v4111_v9  ;;  %v4114_v12 = vld [vmem:[%s4465_s5] sm:$0xff]  }
 0x1c3   :  { %v1775_v24 = vadd.f32 %v1774_v13, %v1734_v17  ;;  %v1781_v25 = vmax.f32 %v1773_v14, 0.0  ;;  %v1777_v27 = vpop.f32.mrf.mxu0  ;;  %v4115_v13 = vld [vmem:[%s4465_s5 + $0xf8] sm:$0xff]   ;;  %v4117_v17 = vld [vmem:[%s4465_s5 + $0xf0] sm:$0xff]   ;;  %v4119_v23 = vld [vmem:[%s4465_s5 + $0xe8] sm:$0xff]  }
 0x1c4   :  { %v1736_v26 = vpop.f32.mrf.mxu1  ;;  %3527 = vmatpush3.bf16.msra.mxu0 %v4112_v10  ;;  %v4116_v14 = vld [vmem:[%s4465_s5 + $0xb8] sm:$0xff]   ;;  %v4118_v20 = vld [vmem:[%s4465_s5 + $0xb0] sm:$0xff]  }
 0x1c5   :  { %v1782_v28 = vmax.f32 %v1775_v24, 0.0  ;;  %v4340_v19 = vpack.c.bf16 %v1781_v25, %v1781_v25  ;;  %3528 = vmatprep.subr.bf16.mxu0 %v4113_v11  ;;  %v4120_v24 = vld [vmem:[%s4465_s5 + $0xa8] sm:$0xff]   ;;  %v4121_v25 = vld [vmem:[%s4465_s5 + $0xe0] sm:$0xff]   ;;  %v4123_v27 = vld [vmem:[%s4465_s5 + $0xd8] sm:$0xff]  }
 0x1c6   :  { %v4122_v26 = vld [vmem:[%s4465_s5 + $0xa0] sm:$0xff]  }
 0x1c7   :  { %v1786_v18 = vpack.c.bf16 %v1782_v28, %v1782_v28  ;;  %v4124_v28 = vld [vmem:[%s4465_s5 + $0x98] sm:$0xff]  }
 0x1c8   :  { %3529 = vmatpush3.bf16.msra.mxu0 %v4114_v12 }
 0x1c9   :  { %2650 = vmatprep.mubr.bf16.mxu1 %v1786_v18 }
 0x1ca   :  { %2651 = vmatmul.mubr.bf16.vlgmr.msra.gmra.mxu1 %v4340_v19 }
 0x1cb   :  { %2701 = vmatpush1.bf16.msra.mxu1 %v4051_v1  ;;  %2732 = vmatprep.mubr.bf16.mxu1 %v1786_v18  ;;  %v4125_v18 = vld [vmem:[%s4465_s5 + $0xd0] sm:$0xff]  }
 0x1cc   :  { %2702 = vmatprep.subr.bf16.mxu1 %v4056_v21  ;;  %v4126_v1 = vld [vmem:[%s4465_s5 + $0x90] sm:$0xff]  }
 0x1cf   :  { %2703 = vmatpush1.bf16.msra.mxu1 %v4054_v22 }
 0x1d0   :  { %2704 = vmatprep.subr.bf16.mxu1 %v4059_v29 }
 0x1d3   :  { %2705 = vmatpush1.bf16.msra.mxu1 %v4057_v30  ;;  %v4127_v30 = vld [vmem:[%s4465_s5 + $0xc8] sm:$0xff]  }
 0x1d4   :  { %2706 = vmatprep.subr.bf16.mxu1 %v4062_v31  ;;  %v4128_v31 = vld [vmem:[%s4465_s5 + $0x88] sm:$0xff]  }
 0x1d7   :  { %2707 = vmatpush1.bf16.msra.mxu1 %v4060_v32  ;;  %v4129_v32 = vld [vmem:[%s4465_s5 + $0xc0] sm:$0xff]  }
 0x1d8   :  { %2708 = vmatprep.subr.bf16.mxu1 %v4065_v33  ;;  %v4130_v33 = vld [vmem:[%s4465_s5 + $0x80] sm:$0xff]  }
 0x1db   :  { %2709 = vmatpush1.bf16.msra.mxu1 %v4063_v7 }
 0x1dc   :  { %2710 = vmatprep.subr.bf16.mxu1 %v4068_v51 }
 0x1df   :  { %2711 = vmatpush1.bf16.msra.mxu1 %v4066_v34 }
 0x1e0   :  { %2712 = vmatprep.subr.bf16.mxu1 %v4071_v36 }
 0x1e3   :  { %2713 = vmatpush1.bf16.msra.mxu1 %v4069_v37  ;;  %v1915_v37 = vld [vmem:[%s4464_s4] sm:$0xf] }
 0x1e4   :  { %2714 = vmatprep.subr.bf16.mxu1 %v4074_v16  ;;  %v1920_v16 = vrot.slane %v1915_v37, %v288_v0  ;;  %v1928_v0 = vrot.slane %v1915_v37, %v296_v62 }
 0x1e7   :  { %2715 = vmatpush1.bf16.msra.mxu1 %v4072_v38  ;;  %v1924_v38 = vrot.slane %v1915_v37, %v292_v2  ;;  %v1932_v2 = vrot.slane %v1915_v37, %v300_v47  ;;  %v3481_v47 = vld [vmem:[%s4466_s6] ss:$0 sm:$0xff]  ;;  %s4207_s6 = smov [#allocation7]  }
 0x1e8   :  { %2716 = vmatprep.subr.bf16.mxu1 %v4077_v39  ;;  %s3112_s10 = sshll.u32 %s4207_s6, 4  ;;  %s3113_s10 = int_to_ptr.vmem [resolvable:$true] %s3112_s10 }
 0x1e9   :  { %s4176_s11 = scalar_lea.vmem %s3113_s10, 128  ;;  %p4181_p11 = scmp.lt.s32.totalorder %s3113_s10, %s3113_s10 }
 0x1ea   :  { %p4177_p10 = scmp.ne.s32.totalorder %s3113_s10, %s4176_s11  ;;  %p4182_p12 = scmp.lt.s32.totalorder %s4176_s11, %s4176_s11 }
 0x1eb   :  { %2717 = vmatpush2.bf16.msra.mxu1 %v4075_v40 }
 0x1ec   :  { %2718 = vmatprep.subr.bf16.mxu1 %v4080_v41  ;;  %p4183_p13 = por %p4182_p12, %p4181_p11 }
 0x1ee   :  { %p4184_p0 = pnand %p4183_p13, %p4177_p10 }
 0x1ef   :  { %2719 = vmatpush2.bf16.msra.mxu1 %v4078_v42 }
 0x1f0   :  { %2720 = vmatprep.subr.bf16.mxu1 %v4083_v43 }
 0x1f3   :  { %2721 = vmatpush2.bf16.msra.mxu1 %v4081_v44 }
 0x1f4   :  { %2722 = vmatprep.subr.bf16.mxu1 %v4086_v45 }
 0x1f7   :  { %2723 = vmatpush2.bf16.msra.mxu1 %v4084_v50 }
 0x1f8   :  { %2724 = vmatprep.subr.bf16.mxu1 %v4089_v53 }
 0x1fb   :  { %2725 = vmatpush2.bf16.msra.mxu1 %v4087_v55 }
 0x1fc   :  { %2726 = vmatprep.subr.bf16.mxu1 %v4092_v57 }
 0x1ff   :  { %2727 = vmatpush2.bf16.msra.mxu1 %v4090_v59 }
 0x200   :  { %2728 = vmatprep.subr.bf16.mxu1 %v4095_v61 }
 0x203   :  { %2729 = vmatpush2.bf16.msra.mxu1 %v4093_v6 }
 0x204   :  { %2730 = vmatprep.subr.bf16.mxu1 %v4098_v4 }
 0x207   :  { %2731 = vmatpush2.bf16.msra.mxu1 %v4096_v5 }
 0x208   :  { %3536 = vmatprep.subr.bf16.mxu1 %v4115_v13 }
 0x20a   :  { %2733 = vmatmul.mubr.bf16.vlgmr.msra.gmra.mxu1 %v4340_v19 }
 0x20b   :  { %3537 = vmatpush3.bf16.msra.mxu1 %v4116_v14 }
 0x20c   :  { %3538 = vmatprep.subr.bf16.mxu1 %v4117_v17 }
 0x20f   :  { %3539 = vmatpush3.bf16.msra.mxu1 %v4118_v20 }
 0x210   :  { %3540 = vmatprep.subr.bf16.mxu1 %v4119_v23 }
 0x213   :  { %3541 = vmatpush3.bf16.msra.mxu1 %v4120_v24 }
 0x214   :  { %3542 = vmatprep.subr.bf16.mxu1 %v4121_v25 }
 0x217   :  { %3543 = vmatpush3.bf16.msra.mxu1 %v4122_v26 }
 0x218   :  { %3544 = vmatprep.subr.bf16.mxu1 %v4123_v27 }
 0x21b   :  { %3545 = vmatpush3.bf16.msra.mxu1 %v4124_v28 }
 0x21c   :  { %3546 = vmatprep.subr.bf16.mxu1 %v4125_v18 }
 0x21f   :  { %3547 = vmatpush3.bf16.msra.mxu1 %v4126_v1 }
 0x220   :  { %3548 = vmatprep.subr.bf16.mxu1 %v4127_v30 }
 0x223   :  { %3549 = vmatpush3.bf16.msra.mxu1 %v4128_v31 }
 0x224   :  { %3550 = vmatprep.subr.bf16.mxu1 %v4129_v32 }
 0x227   :  { %3551 = vmatpush3.bf16.msra.mxu1 %v4130_v33 }
 0x229   :  { %v2611_v19 = vpop.f32.mrf.mxu0 }
 0x22a   :  { %v2612_v39 = vadd.f32 %v2611_v19, %v1920_v16 }
 0x22b   :  { %v2613_v21 = vpop.f32.mrf.mxu0 }
 0x22c   :  { %v2614_v41 = vadd.f32 %v2613_v21, %v1924_v38 }
 0x22d   :  { %v2615_v22 = vpop.f32.mrf.mxu0 }
 0x22f   :  { %v2616_v29 = vpop.f32.mrf.mxu0 }
 0x269   :  { %v2693_v7 = vpop.f32.mrf.mxu0 }
 0x26a   :  { %v2694_v53 = vadd.f32 %v2693_v7, %v1928_v0 }
 0x26b   :  { %v2695_v51 = vpop.f32.mrf.mxu0 }
 0x26c   :  { %v2696_v55 = vadd.f32 %v2695_v51, %v1932_v2 }
 0x26d   :  { %v2697_v34 = vpop.f32.mrf.mxu0 }
 0x26f   :  { %v2698_v36 = vpop.f32.mrf.mxu0 }
 0x28a   :  { %v2652_v40 = vpop.f32.mrf.mxu1 }
 0x28b   :  { %v2653_v42 = vadd.f32 %v2652_v40, %v2612_v39 }
 0x28c   :  { %v2654_v43 = vpop.f32.mrf.mxu1 }
 0x28d   :  { %v2655_v44 = vadd.f32 %v2654_v43, %v2614_v41  ;;  %v2741_v45 = vmax.f32 %v2653_v42, 0.0 }
 0x28e   :  { %v2656_v46 = vpop.f32.mrf.mxu1 }
 0x28f   :  { %v2742_v48 = vmax.f32 %v2655_v44, 0.0  ;;  %v2745_v52 = vpack.c.bf16 %v2741_v45, %v2741_v45 }
 0x290   :  { %v2657_v49 = vpop.f32.mrf.mxu1 }
 0x291   :  { %v2746_v50 = vpack.c.bf16 %v2742_v48, %v2742_v48 }
 0x293   :  { %3044 = vmatprep.mubr.bf16.mxu0 %v2746_v50 }
 0x294   :  { %3045 = vmatmul.mubr.bf16.vlgmr.msra.gmra.mxu0 %v2745_v52 }
 0x2ca   :  { %v2734_v54 = vpop.f32.mrf.mxu1 }
 0x2cb   :  { %v2735_v56 = vadd.f32 %v2734_v54, %v2694_v53 }
 0x2cc   :  { %v2736_v57 = vpop.f32.mrf.mxu1 }
 0x2cd   :  { %v2737_v58 = vadd.f32 %v2736_v57, %v2696_v55  ;;  %v2743_v59 = vmax.f32 %v2735_v56, 0.0 }
 0x2ce   :  { %v2738_v60 = vpop.f32.mrf.mxu1 }
 0x2cf   :  { %v2744_v61 = vmax.f32 %v2737_v58, 0.0  ;;  %v2747_v3 = vpack.c.bf16 %v2743_v59, %v2743_v59 }
 0x2d0   :  { %v2739_v15 = vpop.f32.mrf.mxu1 }
 0x2d1   :  { %v2748_v6 = vpack.c.bf16 %v2744_v61, %v2744_v61 }
 0x2d3   :  { %3084 = vmatprep.mubr.bf16.mxu1 %v2748_v6 }
 0x2d4   :  { %3085 = vmatmul.mubr.bf16.vlgmr.msra.gmra.mxu1 %v2747_v3 }
 0x354   :  { %v3530_v4 = vpop.f32.mrf.mxu0 }
 0x356   :  { %v3531_v35 = vpop.f32.mrf.mxu0 }
 0x357   :  { %v3532_v63 = vadd.f32 %v3531_v35, %v3530_v4 }
 0x358   :  { %v3533_v62 = vpop.f32.mrf.mxu0 }
 0x359   :  { %v3047_v10 = vadd.f32 %v3532_v63, %v3481_v47 }
 0x35a   :  { %v3534_v5 = vpop.f32.mrf.mxu0 }
 0x394   :  { %v3552_v8 = vpop.f32.mrf.mxu1 }
 0x396   :  { %v3553_v9 = vpop.f32.mrf.mxu1 }
 0x397   :  { %v3554_v11 = vadd.f32 %v3553_v9, %v3552_v8 }
 0x398   :  { %v3555_v12 = vpop.f32.mrf.mxu1 }
 0x399   :  { %v3087_v13 = vadd.f32 %v3554_v11, %v3047_v10 }
 0x39a   :  { %v3556_v14 = vpop.f32.mrf.mxu1 }
 0x39b   :  { %v3093_v17 = vsel %vm3092_vm0, %v3087_v13, -inf }
 0x39c   :  { %3094 = vmax.xlane.f32.xlu0 %v3093_v17 }
 0x425   :  { %v3095_v20 = vpop.xlane.xlu0 %3094 }
 0x426   :  { %v3096_v23 = vsub.f32 %v3087_v13, %v3095_v20 }
 0x428   :  { %v3097_v24 = vmul.f32 1.442695, %v3096_v23 }
 0x42a   :  { %4131 = vpow2.f32 %v3097_v24 }
 0x437   :  { %v4132_v25 = vpop.eup %4131 }
 0x438   :  { %v3099_v26 = vsel %vm3092_vm0, %v4132_v25, 0.0 }
 0x439   :  { %3100 = vadd.xlane.f32.xlu0 %v3099_v26 }
 0x4c2   :  { %v3101_v27 = vpop.xlane.xlu0 %3100 }
 0x4c3   :  { %4133 = vlog2.f32 %v3101_v27 }
 0x4d0   :  { %v4134_v28 = vpop.eup %4133 }
 0x4d1   :  { %v3103_v18 = vmul.f32 0.6931472, %v4134_v28 }
 0x4d3   :  { %v3104_v1 = vsub.f32 %v3096_v23, %v3103_v18 }
 0x4d5   :  { %3105 = vst.msk [vmem:[#allocation7] sm:$0xff] %vm3092_vm0, %v3104_v1 }
 0x4d6   :  { %4187 = shalt.err (!%p4184_p0)
}
 0x4d7   :  { %3115 = dma.vmem_to_hbm [thread:$0]  %s3113_s10, 128, %s4467_s7, [#allocation4]  }
 0x4d8   :  { %4200 = dma.done.wait [#allocation4], 128  }
 0x4d9   :  { %4201 = vsyncadd [#allocation4], 4294967168 }
 0x4da   :  { %3119 = vsyncpa [#allocation3], 1 }
 0x4db   :  { %3120 = vsyncpa [#allocation6], 1 }
 0x4dc   :  { %3121 = vsyncpa [#allocation4], 1 }

</bundles_post_ra>
